<compile_context>
chip_gen: v7x
topology: tpu7x:2x2x1
jax: 0.10.0
libtpu: 0.0.40
codegen_flags: <defaults>
</compile_context>

<pallas_src>
import jax
import jax.numpy as jnp
from jax.experimental import pallas as pl
from jax.experimental.pallas import tpu as pltpu

BN_EPS = 1e-5


# ----------------------------- Pallas kernel --------------------------------
def _coarse_kernel(x_ref, w1_ref, s1_ref, t1_ref, w2_ref, s2_ref, t2_ref,
                   w3_ref, b3_ref, out_ref):
    C, TN = x_ref.shape            # full channel axis x lane-dense spatial tile
    M = C // 8                     # reduced time length (output rows)
    E5 = w1_ref.shape[0]
    E = E5 // 5
    f32 = jnp.float32

    w1 = w1_ref[...]               # (5E, 16) conv1 taps vs window x[8u-8 .. 8u+7]
    s1 = s1_ref[...]               # (5E, 1)  conv1 bias + BN1 folded scale/shift
    t1 = t1_ref[...]
    w2 = w2_ref[...]               # (2E, 5E) [A3s|A0|A1|A2|A3] -> [B0|B1]
    s2 = s2_ref[...]               # (2E, 1)  conv2 bias + BN2 folded scale/shift
    t2 = t2_ref[...]
    w3 = w3_ref[...]               # (8, 2E)  row0: w3[1].B0 + w3[2].B1, row1: w3[0].B1
    b3 = b3_ref[...]               # (1, 1)

    def conv1(window):             # window: (16, TN) = x rows [8u-8, 8u+8)
        pre1 = jnp.dot(w1, window, preferred_element_type=f32)        # (5E, TN)
        return jnp.maximum(pre1 * s1 + t1, 0.0)

    def conv23(h1):                # h1: (5E, TN) = [A3s|A0|A1|A2|A3]
        pre2 = jnp.dot(w2, h1, preferred_element_type=f32)            # (2E, TN)
        h2 = jnp.maximum(pre2 * s2 + t2, 0.0)                         # [B0 | B1]
        s = jnp.dot(w3, h2, preferred_element_type=f32)               # (8, TN)
        return s[0:1, :], s[1:2, :]          # (current-u term, carry to u+1)

    # ---- chunk u == 0: previous-chunk taps are conv1's left zero padding and
    # the A3s slot (rows 0:E of h1) is conv2's left zero padding -> exact zeros.
    win0 = jnp.concatenate([jnp.zeros((8, TN), f32), x_ref[0:8, :]], axis=0)
    h1_0 = conv1(win0)
    h1_0 = jnp.concatenate([jnp.zeros((E, TN), f32), h1_0[E:, :]], axis=0)
    s_cur0, carry0 = conv23(h1_0)
    out_ref[pl.ds(0, 1), :] = s_cur0 + b3

    # ---- chunks u = 1 .. M-1: stream, carrying conv3's cross-u term ---------
    def body(u, carry):
        start = pl.multiple_of((u - 1) * 8, 8)
        window = x_ref[pl.ds(start, 16), :]                           # (16, TN)
        s_cur, s_next = conv23(conv1(window))
        out_ref[pl.ds(u, 1), :] = s_cur + carry + b3
        return s_next

    jax.lax.fori_loop(1, M, body, carry0)


# --------------------------- tile-size selection -----------------------------
def _round_up(x, m):
    return -(-x // m) * m


def _vmem_capacity_bytes():
    try:
        info = pltpu.get_tpu_info()
        cap = getattr(info, "vmem_capacity_bytes", None)
        if cap:
            return int(cap)
    except Exception:
        pass
    return 128 * 1024 * 1024


def _block_vmem_bytes(tn, C, M, E):
    """Rough per-block VMEM footprint (f32, (8,128) padding, double buffers)."""
    lanes = _round_up(tn, 128)
    b = 2 * _round_up(C, 8) * lanes * 4                   # input block, 2 bufs
    b += 2 * _round_up(M, 8) * lanes * 4                  # output block, 2 bufs
    # live streaming temporaries: 16-tap window, pre1/h1 (5E), pre2/h2 (2E),
    # conv3 result + carry + chunk-0 extras
    b += (16 + 2 * 5 * E + 2 * 2 * E + 32) * lanes * 4
    # small resident weights (double-buffered, lane-padded)
    b += 2 * 4 * (_round_up(5 * E, 8) * 128
                  + _round_up(2 * E, 8) * _round_up(5 * E, 128)
                  + 8 * _round_up(2 * E, 128)
                  + 2 * (5 * E + 2 * E) * 128 + 128)
    return b


def _choose_tn(N, C, M, E, budget_bytes):
    """Largest lane-aligned (multiple-of-128) spatial block that divides N and
    fits the VMEM budget; prefer grid >= 2 so both v7x TensorCores get blocks
    (one extra grid step is negligible on single-TC v5e/v6e)."""
    if N % 128 != 0:
        # TODO(synk): non-128-multiple N falls back to one full-width block.
        return N
    cap = max(128, ((N // 2) // 128) * 128)
    best = None
    t = 128
    while t <= cap:
        if N % t == 0 and _block_vmem_bytes(t, C, M, E) <= budget_bytes:
            best = t
        t += 128
    return best if best is not None else N


# ------------------------------- wrapper -------------------------------------
def coarse_forward(x, params):
    """x: (1, input_channels, h, w) f32 -> (1, input_channels // 8, h, w) f32."""
    assert x.ndim == 4 and x.shape[0] == 1
    _, C, h, w = x.shape
    assert C % 8 == 0, "input_channels must be divisible by 8 (3 stride-2 convs)"
    N, M = h * w, C // 8
    E = params["w1"].shape[0]
    f32 = jnp.float32

    # native layout: (1, C, h, w) -> (C, N) is a free reshape (no HBM pass).
    x2d = x.reshape(C, N).astype(f32)

    # fold conv bias + eval-mode BatchNorm into per-channel scale/shift columns
    def fold(conv_b, g, b, m, v):
        s = (g / jnp.sqrt(v + BN_EPS)).astype(f32)
        t = (b - m * s).astype(f32) + conv_b.astype(f32) * s
        return s, t

    s1, t1 = fold(params["b1"], params["bn1_g"], params["bn1_b"],
                  params["bn1_m"], params["bn1_v"])
    s2, t2 = fold(params["b2"], params["bn2_g"], params["bn2_b"],
                  params["bn2_m"], params["bn2_v"])
    s1c = jnp.tile(s1, 5).reshape(5 * E, 1)               # rows of h1: p*E + e
    t1c = jnp.tile(t1, 5).reshape(5 * E, 1)
    s2c = jnp.tile(s2, 2).reshape(2 * E, 1)               # rows of h2: [B0 | B1]
    t2c = jnp.tile(t2, 2).reshape(2 * E, 1)

    # conv1 weight against the 16-tap window x[8u-8 .. 8u+7]: phase slot p
    # (p=0 -> A3s = conv1@4u-1, p=1..4 -> A0..A3 = conv1@4u..4u+3) uses taps
    # x[8u + 2p - 3 + k], i.e. window column j = 2p + 5 + k.
    w1k = params["w1"][:, 0, :].astype(f32)               # (E, 3)
    w1win = jnp.zeros((5 * E, 16), f32)
    for p in range(5):
        for k in range(3):
            w1win = w1win.at[p * E:(p + 1) * E, 2 * p + 5 + k].set(w1k[:, k])

    # conv2 stacked weight: [B0 | B1] = w2T @ [A3s|A0|A1|A2|A3]
    w2t = jnp.transpose(params["w2"], (2, 1, 0)).astype(f32)  # (3, E_in, E_out)
    zE = jnp.zeros((E, E), f32)
    w2s = jnp.concatenate([
        jnp.concatenate([w2t[0], zE], axis=1),
        jnp.concatenate([w2t[1], zE], axis=1),
        jnp.concatenate([w2t[2], w2t[0]], axis=1),
        jnp.concatenate([zE, w2t[1]], axis=1),
        jnp.concatenate([zE, w2t[2]], axis=1)], axis=0)       # (5E, 2E)
    w2T = w2s.T                                               # (2E, 5E)

    # conv3 E-reduction as a tiny MXU matmul (8, 2E) @ h2(2E, TN):
    #   row 0 -> <w3[1], B0[u]> + <w3[2], B1[u]>   (current-u part of out[u])
    #   row 1 -> <w3[0], B1[u]>                    (carried into out[u+1])
    w3k = params["w3"][0].astype(f32)                         # (E, 3)
    w3p = jnp.zeros((8, 2 * E), f32)
    w3p = w3p.at[0, :E].set(w3k[:, 1])
    w3p = w3p.at[0, E:].set(w3k[:, 2])
    w3p = w3p.at[1, E:].set(w3k[:, 0])
    b3 = params["b3"].reshape(1, 1).astype(f32)

    vmem_cap = _vmem_capacity_bytes()
    budget = min(vmem_cap * 3 // 8, 48 * 1024 * 1024)   # ~48MiB v5e/v6e, ~24MiB v7x
    limit = min(vmem_cap * 3 // 4, 96 * 1024 * 1024)    # ~96MiB v5e/v6e, ~48MiB v7x
    TN = _choose_tn(N, C, M, E, budget)

    full2 = lambda shape: pl.BlockSpec(shape, lambda i: (0, 0))

    out2d = pl.pallas_call(
        _coarse_kernel,
        out_shape=jax.ShapeDtypeStruct((M, N), f32),
        grid=(N // TN,),
        in_specs=[
            pl.BlockSpec((C, TN), lambda i: (0, i)),
            full2((5 * E, 16)), full2((5 * E, 1)), full2((5 * E, 1)),
            full2((2 * E, 5 * E)), full2((2 * E, 1)), full2((2 * E, 1)),
            full2((8, 2 * E)), full2((1, 1)),
        ],
        out_specs=pl.BlockSpec((M, TN), lambda i: (0, i)),
        compiler_params=pltpu.CompilerParams(
            dimension_semantics=("parallel",),
            vmem_limit_bytes=limit),
    )(x2d, w1win, s1c, t1c, w2T, s2c, t2c, w3p, b3)

    # z1.view(h, w, 1, M).permute(2, 3, 0, 1) == out2d.reshape(1, M, h, w): free.
    return out2d.reshape(1, M, h, w)


# ----------------------- deterministic parameter init ------------------------
def init_params(key, embed_dim=32):
    E = embed_dim
    ks = jax.random.split(key, 10)
    nrm = lambda k, shape, s: s * jax.random.normal(k, shape, jnp.float32)
    return {
        "w1": nrm(ks[0], (E, 1, 3), 0.5),
        "b1": nrm(ks[1], (E,), 0.1),
        "bn1_g": 1.0 + 0.1 * jax.random.normal(ks[2], (E,), jnp.float32),
        "bn1_b": nrm(ks[3], (E,), 0.1),
        "bn1_m": jnp.zeros((E,), jnp.float32),
        "bn1_v": jnp.ones((E,), jnp.float32),
        "w2": nrm(ks[4], (E, E, 3), 0.2),
        "b2": nrm(ks[5], (E,), 0.1),
        "bn2_g": 1.0 + 0.1 * jax.random.normal(ks[6], (E,), jnp.float32),
        "bn2_b": nrm(ks[7], (E,), 0.1),
        "bn2_m": jnp.zeros((E,), jnp.float32),
        "bn2_v": jnp.ones((E,), jnp.float32),
        "w3": nrm(ks[8], (1, E, 3), 0.2),
        "b3": nrm(ks[9], (1,), 0.1),
    }


# ------------------------ pure-JAX reference (checking) ----------------------
def _conv1d_s2(x, w, b):
    # x: (N, Cin, L), w: (Cout, Cin, 3), stride 2, pad 1
    L_out = x.shape[-1] // 2
    xp = jnp.pad(x, ((0, 0), (0, 0), (1, 1)))
    out = jnp.zeros((x.shape[0], w.shape[0], L_out), jnp.float32)
    for k in range(3):
        tap = xp[:, :, k:k + 2 * L_out:2]
        out = out + jnp.einsum("nct,oc->not", tap, w[:, :, k])
    return out + b[None, :, None]


def ref_forward(x, p):
    _, C, h, w = x.shape
    xr = x.reshape(C, h * w).T[:, None, :]                    # (N, 1, C)

    def bn(z, g, b, m, v):
        return ((z - m[None, :, None]) / jnp.sqrt(v[None, :, None] + BN_EPS)
                * g[None, :, None] + b[None, :, None])

    z = _conv1d_s2(xr, p["w1"], p["b1"])
    z = jax.nn.relu(bn(z, p["bn1_g"], p["bn1_b"], p["bn1_m"], p["bn1_v"]))
    z = _conv1d_s2(z, p["w2"], p["b2"])
    z = jax.nn.relu(bn(z, p["bn2_g"], p["bn2_b"], p["bn2_m"], p["bn2_v"]))
    z = _conv1d_s2(z, p["w3"], p["b3"])                       # (N, 1, C // 8)
    return jnp.transpose(z.reshape(h, w, 1, -1), (2, 3, 0, 1))


if __name__ == "__main__":
    key = jax.random.PRNGKey(0)
    k_param, k_x = jax.random.split(key)
    # small shapes: input_channels=64, embed_dim=32, 16x16 spatial (N=256 so
    # the tiled / grid=2 path is exercised)
    C, h, w, E = 64, 16, 16, 32
    params = init_params(k_param, embed_dim=E)
    x = jax.random.normal(k_x, (1, C, h, w), jnp.float32)

    out = coarse_forward(x, params)
    out = jax.block_until_ready(out)

    ref = ref_forward(x, params)
    assert out.shape == (1, C // 8, h, w), out.shape
    max_err = float(jnp.max(jnp.abs(out - ref)))
    assert max_err < 1e-3, f"kernel/reference mismatch, max abs err = {max_err}"
    print("KERNEL_OK")
</pallas_src>

<mosaic_0001>
module attributes {stable_mosaic.version = 11 : i64} {
  func.func @_coarse_kernel(%arg0: i32, %arg1: memref<64x128xf32, #tpu.memory_space<vmem>>, %arg2: memref<160x16xf32, #tpu.memory_space<vmem>>, %arg3: memref<160x1xf32, #tpu.memory_space<vmem>>, %arg4: memref<160x1xf32, #tpu.memory_space<vmem>>, %arg5: memref<64x160xf32, #tpu.memory_space<vmem>>, %arg6: memref<64x1xf32, #tpu.memory_space<vmem>>, %arg7: memref<64x1xf32, #tpu.memory_space<vmem>>, %arg8: memref<8x64xf32, #tpu.memory_space<vmem>>, %arg9: memref<1x1xf32, #tpu.memory_space<vmem>>, %arg10: memref<8x128xf32, #tpu.memory_space<vmem>>) attributes {dimension_semantics = [#tpu.dimension_semantics<parallel>], iteration_bounds = array<i64: 2>, scalar_prefetch = 0 : i64, scratch_operands = 0 : i64, tpu.core_type = #tpu.core_type<tc>, window_params = [{transform_indices = @transform_0, window_bounds = array<i64: 64, 128>}, {pipeline_mode = #tpu.pipeline_mode<synchronous>, transform_indices = @transform_1, window_bounds = array<i64: 160, 16>}, {pipeline_mode = #tpu.pipeline_mode<synchronous>, transform_indices = @transform_2, window_bounds = array<i64: 160, 1>}, {pipeline_mode = #tpu.pipeline_mode<synchronous>, transform_indices = @transform_3, window_bounds = array<i64: 160, 1>}, {pipeline_mode = #tpu.pipeline_mode<synchronous>, transform_indices = @transform_4, window_bounds = array<i64: 64, 160>}, {pipeline_mode = #tpu.pipeline_mode<synchronous>, transform_indices = @transform_5, window_bounds = array<i64: 64, 1>}, {pipeline_mode = #tpu.pipeline_mode<synchronous>, transform_indices = @transform_6, window_bounds = array<i64: 64, 1>}, {pipeline_mode = #tpu.pipeline_mode<synchronous>, transform_indices = @transform_7, window_bounds = array<i64: 8, 64>}, {pipeline_mode = #tpu.pipeline_mode<synchronous>, transform_indices = @transform_8, window_bounds = array<i64: 1, 1>}, {transform_indices = @transform_9, window_bounds = array<i64: 8, 128>}]} {
    %c0 = arith.constant 0 : index
    %c0_0 = arith.constant 0 : index
    %0 = vector.load %arg2[%c0, %c0_0] : memref<160x16xf32, #tpu.memory_space<vmem>>, vector<160x16xf32>
    %c0_1 = arith.constant 0 : index
    %c0_2 = arith.constant 0 : index
    %1 = vector.load %arg3[%c0_1, %c0_2] : memref<160x1xf32, #tpu.memory_space<vmem>>, vector<160x1xf32>
    %c0_3 = arith.constant 0 : index
    %c0_4 = arith.constant 0 : index
    %2 = vector.load %arg4[%c0_3, %c0_4] : memref<160x1xf32, #tpu.memory_space<vmem>>, vector<160x1xf32>
    %c0_5 = arith.constant 0 : index
    %c0_6 = arith.constant 0 : index
    %3 = vector.load %arg5[%c0_5, %c0_6] : memref<64x160xf32, #tpu.memory_space<vmem>>, vector<64x160xf32>
    %c0_7 = arith.constant 0 : index
    %c0_8 = arith.constant 0 : index
    %4 = vector.load %arg6[%c0_7, %c0_8] : memref<64x1xf32, #tpu.memory_space<vmem>>, vector<64x1xf32>
    %c0_9 = arith.constant 0 : index
    %c0_10 = arith.constant 0 : index
    %5 = vector.load %arg7[%c0_9, %c0_10] : memref<64x1xf32, #tpu.memory_space<vmem>>, vector<64x1xf32>
    %c0_11 = arith.constant 0 : index
    %c0_12 = arith.constant 0 : index
    %6 = vector.load %arg8[%c0_11, %c0_12] : memref<8x64xf32, #tpu.memory_space<vmem>>, vector<8x64xf32>
    %c0_13 = arith.constant 0 : index
    %c0_14 = arith.constant 0 : index
    %7 = vector.load %arg9[%c0_13, %c0_14] : memref<1x1xf32, #tpu.memory_space<vmem>>, vector<1x1xf32>
    %cst = arith.constant 0.000000e+00 : f32
    %8 = vector.broadcast %cst : f32 to vector<8x128xf32>
    %c0_15 = arith.constant 0 : index
    %c0_16 = arith.constant 0 : index
    %9 = vector.load %arg1[%c0_15, %c0_16] : memref<64x128xf32, #tpu.memory_space<vmem>>, vector<8x128xf32>
    %10 = tpu.concatenate %8, %9 in 0 : vector<8x128xf32>, vector<8x128xf32> -> vector<16x128xf32>
    %cst_17 = arith.constant dense<0.000000e+00> : vector<160x128xf32>
    %11 = tpu.matmul %0, %10, %cst_17 {dimension_numbers = #tpu.dot_dimension_numbers<[1], [0], [0], [1], [0, 0, 1, 1], [], []>} : vector<160x16xf32>, vector<16x128xf32>, vector<160x128xf32> -> vector<160x128xf32>
    %12 = vector.broadcast %1 : vector<160x1xf32> to vector<160x128xf32>
    %13 = arith.mulf %11, %12 : vector<160x128xf32>
    %14 = vector.broadcast %2 : vector<160x1xf32> to vector<160x128xf32>
    %15 = arith.addf %13, %14 : vector<160x128xf32>
    %cst_18 = arith.constant 0.000000e+00 : f32
    %16 = vector.broadcast %cst_18 : f32 to vector<160x128xf32>
    %17 = arith.maximumf %15, %16 : vector<160x128xf32>
    %cst_19 = arith.constant 0.000000e+00 : f32
    %18 = vector.broadcast %cst_19 : f32 to vector<32x128xf32>
    %19 = vector.extract_strided_slice %17 {offsets = [32, 0], sizes = [128, 128], strides = [1, 1]} : vector<160x128xf32> to vector<128x128xf32>
    %20 = tpu.concatenate %18, %19 in 0 : vector<32x128xf32>, vector<128x128xf32> -> vector<160x128xf32>
    %cst_20 = arith.constant dense<0.000000e+00> : vector<64x128xf32>
    %21 = tpu.matmul %3, %20, %cst_20 {dimension_numbers = #tpu.dot_dimension_numbers<[1], [0], [0], [1], [0, 0, 1, 1], [], []>} : vector<64x160xf32>, vector<160x128xf32>, vector<64x128xf32> -> vector<64x128xf32>
    %22 = vector.broadcast %4 : vector<64x1xf32> to vector<64x128xf32>
    %23 = arith.mulf %21, %22 : vector<64x128xf32>
    %24 = vector.broadcast %5 : vector<64x1xf32> to vector<64x128xf32>
    %25 = arith.addf %23, %24 : vector<64x128xf32>
    %cst_21 = arith.constant 0.000000e+00 : f32
    %26 = vector.broadcast %cst_21 : f32 to vector<64x128xf32>
    %27 = arith.maximumf %25, %26 : vector<64x128xf32>
    %cst_22 = arith.constant dense<0.000000e+00> : vector<8x128xf32>
    %28 = tpu.matmul %6, %27, %cst_22 {dimension_numbers = #tpu.dot_dimension_numbers<[1], [0], [0], [1], [0, 0, 1, 1], [], []>} : vector<8x64xf32>, vector<64x128xf32>, vector<8x128xf32> -> vector<8x128xf32>
    %29 = vector.extract_strided_slice %28 {offsets = [0, 0], sizes = [1, 128], strides = [1, 1]} : vector<8x128xf32> to vector<1x128xf32>
    %30 = vector.extract_strided_slice %28 {offsets = [1, 0], sizes = [1, 128], strides = [1, 1]} : vector<8x128xf32> to vector<1x128xf32>
    %31 = vector.broadcast %7 : vector<1x1xf32> to vector<1x128xf32>
    %32 = arith.addf %29, %31 : vector<1x128xf32>
    %c0_23 = arith.constant 0 : index
    %c0_24 = arith.constant 0 : index
    %33 = vector.load %arg10[%c0_23, %c0_24] : memref<8x128xf32, #tpu.memory_space<vmem>>, vector<1x128xf32>
    tpu.vector_store %arg10[%c0_23, %c0_24], %32 {strides = array<i32>} : memref<8x128xf32, #tpu.memory_space<vmem>>, vector<1x128xf32>,
    %c1_i32 = arith.constant 1 : i32
    %c7_i32 = arith.constant 7 : i32
    %34 = arith.addi %c1_i32, %c7_i32 : i32
    %c1_i32_25 = arith.constant 1 : i32
    %35 = scf.for %arg11 = %c1_i32 to %34 step %c1_i32_25 iter_args(%arg12 = %30) -> (vector<1x128xf32>)  : i32 {
      %c1_i32_27 = arith.constant 1 : i32
      %36 = arith.subi %arg11, %c1_i32_27 : i32
      %c8_i32 = arith.constant 8 : i32
      %37 = arith.muli %36, %c8_i32 : i32
      %38 = tpu.assume_multiple %37, 8 : i32
      %39 = arith.index_cast %38 : i32 to index
      %c0_28 = arith.constant 0 : index
      %40 = vector.load %arg1[%39, %c0_28] : memref<64x128xf32, #tpu.memory_space<vmem>>, vector<16x128xf32>
      %cst_29 = arith.constant dense<0.000000e+00> : vector<160x128xf32>
      %41 = tpu.matmul %0, %40, %cst_29 {dimension_numbers = #tpu.dot_dimension_numbers<[1], [0], [0], [1], [0, 0, 1, 1], [], []>} : vector<160x16xf32>, vector<16x128xf32>, vector<160x128xf32> -> vector<160x128xf32>
      %42 = vector.broadcast %1 : vector<160x1xf32> to vector<160x128xf32>
      %43 = arith.mulf %41, %42 : vector<160x128xf32>
      %44 = vector.broadcast %2 : vector<160x1xf32> to vector<160x128xf32>
      %45 = arith.addf %43, %44 : vector<160x128xf32>
      %cst_30 = arith.constant 0.000000e+00 : f32
      %46 = vector.broadcast %cst_30 : f32 to vector<160x128xf32>
      %47 = arith.maximumf %45, %46 : vector<160x128xf32>
      %cst_31 = arith.constant dense<0.000000e+00> : vector<64x128xf32>
      %48 = tpu.matmul %3, %47, %cst_31 {dimension_numbers = #tpu.dot_dimension_numbers<[1], [0], [0], [1], [0, 0, 1, 1], [], []>} : vector<64x160xf32>, vector<160x128xf32>, vector<64x128xf32> -> vector<64x128xf32>
      %49 = vector.broadcast %4 : vector<64x1xf32> to vector<64x128xf32>
      %50 = arith.mulf %48, %49 : vector<64x128xf32>
      %51 = vector.broadcast %5 : vector<64x1xf32> to vector<64x128xf32>
      %52 = arith.addf %50, %51 : vector<64x128xf32>
      %cst_32 = arith.constant 0.000000e+00 : f32
      %53 = vector.broadcast %cst_32 : f32 to vector<64x128xf32>
      %54 = arith.maximumf %52, %53 : vector<64x128xf32>
      %cst_33 = arith.constant dense<0.000000e+00> : vector<8x128xf32>
      %55 = tpu.matmul %6, %54, %cst_33 {dimension_numbers = #tpu.dot_dimension_numbers<[1], [0], [0], [1], [0, 0, 1, 1], [], []>} : vector<8x64xf32>, vector<64x128xf32>, vector<8x128xf32> -> vector<8x128xf32>
      %56 = vector.extract_strided_slice %55 {offsets = [0, 0], sizes = [1, 128], strides = [1, 1]} : vector<8x128xf32> to vector<1x128xf32>
      %57 = vector.extract_strided_slice %55 {offsets = [1, 0], sizes = [1, 128], strides = [1, 1]} : vector<8x128xf32> to vector<1x128xf32>
      %58 = arith.addf %56, %arg12 : vector<1x128xf32>
      %59 = vector.broadcast %7 : vector<1x1xf32> to vector<1x128xf32>
      %60 = arith.addf %58, %59 : vector<1x128xf32>
      %61 = arith.index_cast %arg11 : i32 to index
      %c0_34 = arith.constant 0 : index
      %62 = vector.load %arg10[%61, %c0_34] : memref<8x128xf32, #tpu.memory_space<vmem>>, vector<1x128xf32>
      tpu.vector_store %arg10[%61, %c0_34], %60 {strides = array<i32>} : memref<8x128xf32, #tpu.memory_space<vmem>>, vector<1x128xf32>,
      scf.yield %57 : vector<1x128xf32>
    }
    %c7_i32_26 = arith.constant 7 : i32
    return
  }
  func.func @transform_0(%arg0: i32) -> (i32, i32) {
    %c0_i32 = arith.constant 0 : i32
    %c0_i32_0 = arith.constant 0 : i32
    return %c0_i32, %arg0 : i32, i32
  }
  func.func @transform_1(%arg0: i32) -> (i32, i32) {
    %c0_i32 = arith.constant 0 : i32
    %c0_i32_0 = arith.constant 0 : i32
    %c0_i32_1 = arith.constant 0 : i32
    return %c0_i32, %c0_i32_0 : i32, i32
  }
  func.func @transform_2(%arg0: i32) -> (i32, i32) {
    %c0_i32 = arith.constant 0 : i32
    %c0_i32_0 = arith.constant 0 : i32
    %c0_i32_1 = arith.constant 0 : i32
    return %c0_i32, %c0_i32_0 : i32, i32
  }
  func.func @transform_3(%arg0: i32) -> (i32, i32) {
    %c0_i32 = arith.constant 0 : i32
    %c0_i32_0 = arith.constant 0 : i32
    %c0_i32_1 = arith.constant 0 : i32
    return %c0_i32, %c0_i32_0 : i32, i32
  }
  func.func @transform_4(%arg0: i32) -> (i32, i32) {
    %c0_i32 = arith.constant 0 : i32
    %c0_i32_0 = arith.constant 0 : i32
    %c0_i32_1 = arith.constant 0 : i32
    return %c0_i32, %c0_i32_0 : i32, i32
  }
  func.func @transform_5(%arg0: i32) -> (i32, i32) {
    %c0_i32 = arith.constant 0 : i32
    %c0_i32_0 = arith.constant 0 : i32
    %c0_i32_1 = arith.constant 0 : i32
    return %c0_i32, %c0_i32_0 : i32, i32
  }
  func.func @transform_6(%arg0: i32) -> (i32, i32) {
    %c0_i32 = arith.constant 0 : i32
    %c0_i32_0 = arith.constant 0 : i32
    %c0_i32_1 = arith.constant 0 : i32
    return %c0_i32, %c0_i32_0 : i32, i32
  }
  func.func @transform_7(%arg0: i32) -> (i32, i32) {
    %c0_i32 = arith.constant 0 : i32
    %c0_i32_0 = arith.constant 0 : i32
    %c0_i32_1 = arith.constant 0 : i32
    return %c0_i32, %c0_i32_0 : i32, i32
  }
  func.func @transform_8(%arg0: i32) -> (i32, i32) {
    %c0_i32 = arith.constant 0 : i32
    %c0_i32_0 = arith.constant 0 : i32
    %c0_i32_1 = arith.constant 0 : i32
    return %c0_i32, %c0_i32_0 : i32, i32
  }
  func.func @transform_9(%arg0: i32) -> (i32, i32) {
    %c0_i32 = arith.constant 0 : i32
    %c0_i32_0 = arith.constant 0 : i32
    return %c0_i32, %arg0 : i32, i32
  }
}

</mosaic_0001>

<bundles_post_ra>
// kernel: tpu_custom_call.1
= control target key start
LH: loop header
LB: loop body
LE: loop exit
PB: predicated region body
PF: predicated region fallthrough
CT: control target
= control target key end

     0   :  { %s3672_s0 = inlined_call_operand.hbm [shape: f32[64,256], index: 0, kind: input, shape index: {}]   ;;  %s3673_s1 = inlined_call_operand.hbm [shape: f32[160,16], index: 1, kind: input, shape index: {}]   ;;  %s3674_s2 = inlined_call_operand.hbm [shape: f32[160,1], index: 2, kind: input, shape index: {}]   ;;  %s3675_s3 = inlined_call_operand.hbm [shape: f32[160,1], index: 3, kind: input, shape index: {}]   ;;  %s3676_s4 = inlined_call_operand.hbm [shape: f32[64,160], index: 4, kind: input, shape index: {}]   ;;  %s3677_s5 = inlined_call_operand.hbm [shape: f32[64,1], index: 5, kind: input, shape index: {}]   ;;  %s3678_s6 = inlined_call_operand.hbm [shape: f32[64,1], index: 6, kind: input, shape index: {}]   ;;  %s3679_s7 = inlined_call_operand.hbm [shape: f32[8,64], index: 7, kind: input, shape index: {}]   ;;  %s3680_s8 = inlined_call_operand.<no memory space> [shape: f32[1,1], index: 8, kind: input, shape index: {}]   ;;  %s3681_s9 = inlined_call_operand.hbm [shape: f32[8,256], index: 9, kind: output, shape index: {}]  }
   0x1   :  { %3741 = sst [smem:[#allocation78_spill]] %s3673_s1  ;;  %v14_v0 = vstv %s3680_s8 }
   0x2   :  { %3742 = sst [smem:[#allocation79_spill]] %s3674_s2  ;;  %15 = vst [vmem:[#allocation2] sm:$0x1] %v14_v0 }
   0x3   :  { %16 = vsyncpa [#allocation4], 0 }
   0x4   :  { %18 = vsyncpa [#allocation4 + $0x1], 0 }
   0x5   :  { %19 = vsyncpa [#allocation7], 0 }
   0x6   :  { %20 = vsyncpa [#allocation10], 0 }
   0x7   :  { %21 = vsyncpa [#allocation13], 0 }
   0x8   :  { %22 = vsyncpa [#allocation16], 0 }
   0x9   :  { %23 = vsyncpa [#allocation5], 0 }
   0xa   :  { %25 = vsyncpa [#allocation5 + $0x1], 0  ;;  %s2830_s11 = smov 0   ;;  %s2832_s12 = smov 0  }
   0xb   :  { %s2834_s13 = smov 0   ;;  %s2836_s14 = smov 0  }
   0xc LB: > { %s2757_s8 = smov [#allocation6]   ;;  %s2851_s16 = sadd.s32 4294967295, %s2747_s14   ;;  %s2747_s14 = sphi %s2836_s14, %s3882_s14   ;;  %s2743_s13 = sphi %s2834_s13, %s3881_s13   ;;  %s2739_s12 = sphi %s2832_s12, %s3880_s12   ;;  %s2735_s11 = sphi %s2830_s11, %s3879_s11  }
   0xd   : > { %s268_s15 = sshll.u32 %s2757_s8, 4  ;;  %p1942_p0 = scmp.ge.s32.totalorder %s2747_s14, 1  ;;  %s2856_s15 = int_to_ptr.vmem [resolvable:$true] %s268_s15 }
   0xe   : > { %p3682_p1 = scmp.eq.s32.totalorder %s2851_s16, 0  ;;  %p256_p2 = scmp.lt.s32.totalorder %s2747_s14, 3 }
   0xf   : > { %s2758_s18 = smov [#allocation9]   ;;  %s2759_s21 = smov [#allocation12]  }
  0x10   : > { %p2858_p3 = pnand %p1942_p0, %p256_p2  ;;  %s294_s19 = sshll.u32 %s2758_s18, 4  ;;  %s2871_s19 = int_to_ptr.vmem [resolvable:$true] %s294_s19 }
  0x11   : > { %s320_s22 = sshll.u32 %s2759_s21, 4  ;;  %s3745_s1 = sld [smem:[#allocation78_spill]]  ;;  %s2873_s22 = int_to_ptr.vmem [resolvable:$true] %s320_s22 }
  0x12   : > { %s3743_s17 = scalar_select %p2858_p3, 1, 0 }
  0x13   : > { %p2317_p5 = pneg %p2858_p3 }
  0x15   : > { %p2867_p6 = pnand %p2317_p5, %p3682_p1 }
  0x17   : > { %s2431_s25 = scalar_lea.hbm %s3745_s1, 2560  ;;  %p2883_p8 = pneg %p2867_p6 }
  0x18   : > { %p2432_p7 = scmp.ne.s32.totalorder %s3745_s1, %s2431_s25  ;;  %p2438_p11 = scmp.lt.u32.totalorder %s2431_s25, %s3745_s1 }
  0x1a   : > { %p2434_p9 = pnand %p2883_p8, %p2432_p7 }
  0x1c   : > { %p2435_p10 = pneg %p2434_p9 }
  0x1e   : > { %p2440_p12 = pnand %p2438_p11, %p2435_p10 }
  0x20   : > { %2443 = shalt.err (!%p2440_p12)
}
  0x21   : > { %s2444_s10 = scalar_lea.vmem %s2856_s15, 2560  ;;  %p2452_p5 = scmp.lt.s32.totalorder %s2856_s15, %s2856_s15 }
  0x22   : > { %p2445_p13 = scmp.ne.s32.totalorder %s2856_s15, %s2444_s10  ;;  %p2453_p4 = scmp.lt.s32.totalorder %s2444_s10, %s2444_s10 }
  0x24   : > { %p2447_p0 = pnand %p2445_p13, %p2883_p8  ;;  %p2454_p7 = por %p2453_p4, %p2452_p5 }
  0x26   : > { %p2448_p2 = pneg %p2447_p0 }
  0x28   : > { %p2455_p9 = pnand %p2454_p7, %p2448_p2 }
  0x2a   : > { %2458 = shalt.err (!%p2455_p9)
}
  0x2b   : > { %s3684_s8 = smov 128   ;;  %s3686_s18 = smov 8  }
  0x2c   : > { %2320 = dma.hbm_to_vmem [thread:$0]  (!%p2867_p6), %s3745_s1, 2560, %s2856_s15, [#allocation7], %s3684_s8, %s3684_s8, %s3686_s18  }
  0x2d   : > { %s2459_s26 = scalar_lea.hbm %s3675_s3, 2560 }
  0x2e   : > { %p2460_p4 = scmp.ne.s32.totalorder %s3675_s3, %s2459_s26  ;;  %p2466_p12 = scmp.lt.u32.totalorder %s2459_s26, %s3675_s3 }
  0x30   : > { %p2462_p10 = pnand %p2460_p4, %p2883_p8 }
  0x32   : > { %p2463_p11 = pneg %p2462_p10 }
  0x34   : > { %p2468_p13 = pnand %p2466_p12, %p2463_p11 }
  0x36   : > { %2471 = shalt.err (!%p2468_p13)
}
  0x37   : > { %s2472_s15 = scalar_lea.vmem %s2871_s19, 2560  ;;  %p2480_p7 = scmp.lt.s32.totalorder %s2871_s19, %s2871_s19 }
  0x38   : > { %p2473_p0 = scmp.ne.s32.totalorder %s2871_s19, %s2472_s15  ;;  %p2481_p9 = scmp.lt.s32.totalorder %s2472_s15, %s2472_s15 }
  0x3a   : > { %p2475_p2 = pnand %p2473_p0, %p2883_p8  ;;  %p2482_p4 = por %p2481_p9, %p2480_p7 }
  0x3c   : > { %p2476_p5 = pneg %p2475_p2 }
  0x3e   : > { %p2483_p10 = pnand %p2482_p4, %p2476_p5 }
  0x40   : > { %2486 = shalt.err (!%p2483_p10)
}
  0x41   : > { %2326 = dma.hbm_to_vmem [thread:$0]  (!%p2867_p6), %s3675_s3, 2560, %s2871_s19, [#allocation10], %s3684_s8, %s3684_s8, %s3686_s18  }
  0x42   : > { %s2487_s26 = scalar_lea.hbm %s3677_s5, 1024 }
  0x43   : > { %p2488_p11 = scmp.ne.s32.totalorder %s3677_s5, %s2487_s26  ;;  %p2494_p0 = scmp.lt.u32.totalorder %s2487_s26, %s3677_s5 }
  0x45   : > { %p2490_p12 = pnand %p2488_p11, %p2883_p8 }
  0x47   : > { %p2491_p13 = pneg %p2490_p12 }
  0x49   : > { %p2496_p2 = pnand %p2494_p0, %p2491_p13 }
  0x4b   : > { %2499 = shalt.err (!%p2496_p2)
}
  0x4c   : > { %s2500_s19 = scalar_lea.vmem %s2873_s22, 1024  ;;  %p2508_p4 = scmp.lt.s32.totalorder %s2873_s22, %s2873_s22 }
  0x4d   : > { %p2501_p5 = scmp.ne.s32.totalorder %s2873_s22, %s2500_s19  ;;  %p2509_p10 = scmp.lt.s32.totalorder %s2500_s19, %s2500_s19 }
  0x4f   : > { %p2503_p7 = pnand %p2501_p5, %p2883_p8  ;;  %p2510_p11 = por %p2509_p10, %p2508_p4 }
  0x51   : > { %p2504_p9 = pneg %p2503_p7 }
  0x53   : > { %p2511_p12 = pnand %p2510_p11, %p2504_p9 }
  0x55   : > { %2514 = shalt.err (!%p2511_p12)
}
  0x56   : > { %2332 = dma.hbm_to_vmem [thread:$0]  (!%p2867_p6), %s3677_s5, 1024, %s2873_s22, [#allocation13], %s3684_s8, %s3684_s8, %s3686_s18  }
  0x57   : > { %s2762_s23 = smov [#allocation8]   ;;  %s2763_s25 = smov [#allocation11]  }
  0x58   : > { %s281_s24 = sshll.u32 %s2762_s23, 4  ;;  %s307_s26 = sshll.u32 %s2763_s25, 4  ;;  %s282_s24 = int_to_ptr.vmem [resolvable:$true] %s281_s24  ;;  %s308_s26 = int_to_ptr.vmem [resolvable:$true] %s307_s26 }
  0x59   : > { %s3747_s2 = sld [smem:[#allocation79_spill]] }
  0x5f   : > { %s2515_s30 = scalar_lea.hbm %s3747_s2, 2560 }
  0x60   : > { %p2516_p13 = scmp.ne.s32.totalorder %s3747_s2, %s2515_s30  ;;  %p2522_p5 = scmp.lt.u32.totalorder %s2515_s30, %s3747_s2 }
  0x62   : > { %p2518_p0 = pnand %p2516_p13, %p2883_p8 }
  0x64   : > { %p2519_p2 = pneg %p2518_p0 }
  0x66   : > { %p2524_p7 = pnand %p2522_p5, %p2519_p2 }
  0x68   : > { %2527 = shalt.err (!%p2524_p7)
}
  0x69   : > { %s2528_s22 = scalar_lea.vmem %s282_s24, 2560  ;;  %p2536_p11 = scmp.lt.s32.totalorder %s282_s24, %s282_s24 }
  0x6a   : > { %p2529_p9 = scmp.ne.s32.totalorder %s282_s24, %s2528_s22  ;;  %p2537_p12 = scmp.lt.s32.totalorder %s2528_s22, %s2528_s22 }
  0x6c   : > { %p2531_p4 = pnand %p2529_p9, %p2883_p8  ;;  %p2538_p1 = por %p2537_p12, %p2536_p11 }
  0x6e   : > { %p2532_p10 = pneg %p2531_p4 }
  0x70   : > { %p2539_p3 = pnand %p2538_p1, %p2532_p10 }
  0x72   : > { %2542 = shalt.err (!%p2539_p3)
}
  0x73   : > { %2323 = dma.hbm_to_vmem [thread:$0]  (!%p2867_p6), %s3747_s2, 2560, %s282_s24, [#allocation7], %s3684_s8, %s3684_s8, %s3686_s18  }
  0x74   : > { %s2543_s27 = scalar_lea.hbm %s3676_s4, 2048 }
  0x75   : > { %p2544_p1 = scmp.ne.s32.totalorder %s3676_s4, %s2543_s27  ;;  %p2550_p0 = scmp.lt.u32.totalorder %s2543_s27, %s3676_s4 }
  0x77   : > { %p2546_p3 = pnand %p2544_p1, %p2883_p8 }
  0x79   : > { %p2547_p13 = pneg %p2546_p3 }
  0x7b   : > { %p2552_p2 = pnand %p2550_p0, %p2547_p13 }
  0x7d   : > { %2555 = shalt.err (!%p2552_p2)
}
  0x7e   : > { %s2556_s15 = scalar_lea.vmem %s308_s26, 2048  ;;  %p2564_p4 = scmp.lt.s32.totalorder %s308_s26, %s308_s26 }
  0x7f   : > { %p2557_p5 = scmp.ne.s32.totalorder %s308_s26, %s2556_s15  ;;  %p2565_p10 = scmp.lt.s32.totalorder %s2556_s15, %s2556_s15 }
  0x81   : > { %p2559_p7 = pnand %p2557_p5, %p2883_p8  ;;  %p2566_p11 = por %p2565_p10, %p2564_p4 }
  0x83   : > { %p2560_p9 = pneg %p2559_p7 }
  0x85   : > { %p2567_p12 = pnand %p2566_p11, %p2560_p9 }
  0x87   : > { %2570 = shalt.err (!%p2567_p12)
}
  0x88   : > { %s3688_s24 = smov 256   ;;  %s2765_s22 = smov 16  }
  0x89   : > { %2329 = dma.hbm_to_vmem [thread:$0]  (!%p2867_p6), %s3676_s4, 2048, %s308_s26, [#allocation10], %s3688_s24, %s3688_s24, %s2765_s22  }
  0x8a   : > { %s2766_s23 = smov [#allocation14]   ;;  %s2767_s27 = smov [#allocation15]  }
  0x8b   : > { %s333_s25 = sshll.u32 %s2766_s23, 4  ;;  %s347_s29 = sshll.u32 %s2767_s27, 4  ;;  %s334_s25 = int_to_ptr.vmem [resolvable:$true] %s333_s25  ;;  %s348_s29 = int_to_ptr.vmem [resolvable:$true] %s347_s29 }
  0x8c   : > { %s2571_s19 = scalar_lea.hbm %s3678_s6, 1024 }
  0x8d   : > { %p2572_p1 = scmp.ne.s32.totalorder %s3678_s6, %s2571_s19  ;;  %p2578_p0 = scmp.lt.u32.totalorder %s2571_s19, %s3678_s6 }
  0x8f   : > { %p2574_p3 = pnand %p2572_p1, %p2883_p8 }
  0x91   : > { %p2575_p13 = pneg %p2574_p3 }
  0x93   : > { %p2580_p2 = pnand %p2578_p0, %p2575_p13 }
  0x95   : > { %2583 = shalt.err (!%p2580_p2)
}
  0x96   : > { %s2584_s26 = scalar_lea.vmem %s334_s25, 1024  ;;  %p2592_p4 = scmp.lt.s32.totalorder %s334_s25, %s334_s25 }
  0x97   : > { %p2585_p5 = scmp.ne.s32.totalorder %s334_s25, %s2584_s26  ;;  %p2593_p10 = scmp.lt.s32.totalorder %s2584_s26, %s2584_s26 }
  0x99   : > { %p2587_p7 = pnand %p2585_p5, %p2883_p8  ;;  %p2594_p11 = por %p2593_p10, %p2592_p4 }
  0x9b   : > { %p2588_p9 = pneg %p2587_p7 }
  0x9d   : > { %p2595_p12 = pnand %p2594_p11, %p2588_p9 }
  0x9f   : > { %2598 = shalt.err (!%p2595_p12)
}
  0xa0   : > { %s3748_s8 = smov 8   ;;  %s3749_s22 = smov 128  }
  0xa1   : > { %2335 = dma.hbm_to_vmem [thread:$0]  (!%p2867_p6), %s3678_s6, 1024, %s334_s25, [#allocation13], %s3749_s22, %s3749_s22, %s3748_s8  }
  0xa2   : > { %s2599_s23 = scalar_lea.hbm %s3679_s7, 128 }
  0xa3   : > { %p2600_p1 = scmp.ne.s32.totalorder %s3679_s7, %s2599_s23  ;;  %p2606_p0 = scmp.lt.u32.totalorder %s2599_s23, %s3679_s7 }
  0xa5   : > { %p2602_p3 = pnand %p2600_p1, %p2883_p8 }
  0xa7   : > { %p2603_p13 = pneg %p2602_p3 }
  0xa9   : > { %p2608_p2 = pnand %p2606_p0, %p2603_p13 }
  0xab   : > { %2611 = shalt.err (!%p2608_p2)
}
  0xac   : > { %s2612_s15 = scalar_lea.vmem %s348_s29, 128  ;;  %p2620_p4 = scmp.lt.s32.totalorder %s348_s29, %s348_s29 }
  0xad   : > { %p2613_p5 = scmp.ne.s32.totalorder %s348_s29, %s2612_s15  ;;  %p2621_p10 = scmp.lt.s32.totalorder %s2612_s15, %s2612_s15 }
  0xaf   : > { %p2615_p7 = pnand %p2613_p5, %p2883_p8  ;;  %p2622_p11 = por %p2621_p10, %p2620_p4 }
  0xb1   : > { %p2616_p9 = pneg %p2615_p7 }
  0xb3   : > { %p2623_p12 = pnand %p2622_p11, %p2616_p9 }
  0xb5   : > { %2626 = shalt.err (!%p2623_p12)
}
  0xb6   : > { %2338 = dma.hbm_to_vmem [thread:$0]  (!%p2867_p6), %s3679_s7, 128, %s348_s29, [#allocation16]  }
  0xb7   : > { %s1941_s28 = sadd.s32 4294967294, %s2747_s14   ;;  %s3041_s20 = sadd.s32 1, %s2747_s14  }
  0xb8   : > { %s38_s2 = sadd.s32 1, %s2743_s13  ;;  %s35_s18 = ssub.s32 %s2747_s14, %s3041_s20 }
  0xb9   : > { %p45_p8 = scmp.ne.s32.totalorder %s2743_s13, %s2739_s12  ;;  %p36_p1 = scmp.eq.s32.totalorder %s35_s18, 0 }
  0xba   : > { %p46_p3 = scmp.eq.s32.totalorder %s2747_s14, 0  ;;  %p51_p13 = scmp.ne.s32.totalorder %s2739_s12, %s2735_s11 }
  0xbb   : > { %p243_p0 = scmp.eq.s32.totalorder %s2851_s16, 1  ;;  %p3750_p5 = scmp.eq.s32.totalorder %s2851_s16, 0 }
  0xbc   : > { %s3053_s1 = scalar_select %p36_p1, %s2743_s13, %s38_s2  }
  0xbd   : > { %p47_p2 = por %p46_p3, %p45_p8  ;;  %p3057_p7 = por %p3750_p5, %p51_p13 }
  0xbe   : > { %p3061_p6 = por %p243_p0, %p45_p8  ;;  %p249_p9 = scmp.eq.s32.totalorder %s1941_s28, 1 }
  0xbf   : > { %p2354_p4 = scmp.lt.s32.totalorder %s2747_s14, 2  ;;  %s361_s23 = sand.u32 1, %s2743_s13  }
  0xc0   : > { %s3752_s29 = scalar_select %p3061_p6, 1, 0 }
  0xc1   : > { %p3067_p10 = por %p249_p9, %p51_p13  ;;  %s1951_s30 = sshll.u32 %s361_s23, 6 }
  0xc2   : > { %s1952_s10 = sshll.u32 %s2747_s14, 7  ;;  %s365_s26 = scalar_lea.vmem [#allocation3], %s1951_s30 }
  0xc3   : > { %s3753_s27 = scalar_select %p3067_p10, 1, 0 }
  0xc4   : > { %s3075_s25 = scalar_lea.hbm %s3672_s0, %s1952_s10  ;;  %s371_s2 = sshll.u32 %s365_s26, 4  ;;  %s3081_s2 = int_to_ptr.vmem [resolvable:$true] %s371_s2 }
  0xc5   : > { %p3077_p11 = pnand %p2354_p4, %p47_p2  ;;  %s3083_s18 = scalar_lea.sflag [#allocation4], %s361_s23 }
  0xc6   : > { %s2627_s24 = scalar_lea.hbm %s3075_s25, 1024  ;;  %s2632_s19 = scalar_lea.hbm %s3672_s0, 2048 }
  0xc7   : > { %p2628_p12 = scmp.ne.s32.totalorder %s3075_s25, %s2627_s24  ;;  %p2629_p8 = pneg %p3077_p11 }
  0xc8   : > { %p2633_p13 = scmp.lt.u32.totalorder %s3075_s25, %s3672_s0  ;;  %p2634_p0 = scmp.lt.u32.totalorder %s2632_s19, %s2627_s24 }
  0xc9   : > { %p2630_p1 = pnand %p2629_p8, %p2628_p12  ;;  %p2636_p5 = scmp.lt.u32.totalorder %s2627_s24, %s3075_s25 }
  0xca   : > { %p2635_p2 = por %p2634_p0, %p2633_p13 }
  0xcb   : > { %p2631_p3 = pneg %p2630_p1 }
  0xcc   : > { %p2637_p9 = por %p2636_p5, %p2635_p2 }
  0xce   : > { %p2638_p4 = pnand %p2637_p9, %p2631_p3 }
  0xd0   : > { %2641 = shalt.err (!%p2638_p4)
}
  0xd1   : > { %s2642_s23 = scalar_lea.vmem %s3081_s2, 1024  ;;  %s2768_s30 = smov [#allocation3]  }
  0xd2   : > { %p2643_p12 = scmp.ne.s32.totalorder %s3081_s2, %s2642_s23  ;;  %s2647_s10 = sshll.u32 %s2768_s30, 4  ;;  %s2648_s10 = int_to_ptr.vmem [resolvable:$false] %s2647_s10 }
  0xd3   : > { %s2649_s15 = scalar_lea.vmem %s2648_s10, 2048  ;;  %p2650_p6 = scmp.lt.s32.totalorder %s3081_s2, %s2648_s10 }
  0xd4   : > { %p2645_p1 = pnand %p2643_p12, %p2629_p8  ;;  %p2651_p13 = scmp.lt.s32.totalorder %s2649_s15, %s2642_s23 }
  0xd6   : > { %p2646_p10 = pneg %p2645_p1  ;;  %p2652_p0 = por %p2651_p13, %p2650_p6 }
  0xd8   : > { %p2653_p2 = pnand %p2652_p0, %p2646_p10 }
  0xda   : > { %2656 = shalt.err (!%p2653_p2)
}
  0xdb   : > { %s3755_s24 = smov 256   ;;  %p3756_p8 = scmp.ne.s32.totalorder %s3743_s17, 0 }
  0xdc   : > { %2342 = dma.hbm_to_vmem [thread:$0]  (!%p3077_p11), %s3075_s25, 1024, %s3081_s2, %s3083_s18, %s3755_s24, %s3749_s22, %s3748_s8  }
  0xdd   : > { %383 = sbr.rel (%p3756_p8) target bundleno = 1731 (0x6c3), region = 56 }
  0xe4   : > { %s3117_s19 = sand.u32 1, %s2739_s12  }
  0xe5   : > { %s1954_s26 = sshll.u32 %s3117_s19, 6  ;;  %s386_s23 = scalar_lea.sflag [#allocation4], %s3117_s19 }
  0xe6   : > { %s3121_s30 = scalar_lea.vmem [#allocation3], %s1954_s26 }
  0xe7   : > { %2710 = dma.done.wait (%p3057_p7), %s386_s23, 1024  }
  0xe8   : > { %2712 = vsyncadd (%p3057_p7), %s386_s23, 4294966272  ;;  %p3757_p6 = scmp.eq.s32.totalorder %s2851_s16, 0 }
  0xea   : > { %2714 = dma.done.wait (%p3757_p6), [#allocation7], 5120   ;;  %p3758_p10 = pmov %p3757_p6 }
  0xeb   : > { %p3759_p11 = pmov %p3757_p6 }
  0xec   : > { %2716 = vsyncadd (%p3758_p10), [#allocation7], 4294962176 }
  0xed   : > { %2718 = dma.done.wait (%p3759_p11), [#allocation10], 4608   ;;  %p3760_p3 = pmov %p3757_p6 }
  0xef   : > { %2720 = vsyncadd (%p3760_p3), [#allocation10], 4294962688  ;;  %p3761_p5 = pmov %p3760_p3 }
  0xf0   : > { %p3762_p9 = pmov %p3760_p3 }
  0xf1   : > { %2722 = dma.done.wait (%p3761_p5), [#allocation13], 2048  }
  0xf2   : > { %2724 = vsyncadd (%p3762_p9), [#allocation13], 4294965248  ;;  %p3763_p7 = pmov %p3760_p3 }
  0xf3   : > { %p3764_p4 = pmov %p3760_p3 }
  0xf4   : > { %2726 = dma.done.wait (%p3763_p7), [#allocation16], 128  }
  0xf5   : > { %2728 = vsyncadd (%p3764_p4), [#allocation16], 4294967168  ;;  %v2769_v1 = vmov 0   ;;  %vm547_vm0 = vcmask 130048   ;;  %v496_v2 = vld [vmem:[#allocation9 + $0x20] sm:$0xff]  ;;  %v3690_v5 = vmov 0.0  }
  0xf6   : > { %2430 = vset.pattern.permute.xlu1 %v2769_v1  ;;  %2429 = vset.pattern.permute.xlu0 %v2769_v1  ;;  %v476_v3 = vld [vmem:[#allocation8 + $0x20] sm:$0xff]  ;;  %v497_v8 = vld [vmem:[#allocation9 + $0x28] sm:$0xff]  ;;  %v3151_v11 = vld [vmem:[#allocation6 + $0x10] sm:$0xff]  ;;  %vm1017_vm1 = vcmask 261120   ;;  %vm2772_vm2 = vmmov 0   ;;  %vm1251_vm3 = vcmask 523264  }
  0xf7   : > { %v546_v4 = vld [vmem:[%s3121_s30] sm:$0xff]  ;;  %907 = vperm.xlu1 %2430, %v496_v2   ;;  %791 = vperm.xlu0 %2429, %v476_v3   ;;  %v477_v9 = vld [vmem:[#allocation8 + $0x28] sm:$0xff]  ;;  %3767 = vst [vmem:[#allocation26_spill] sm:$0xff] %v3151_v11  ;;  %v479_v12 = vld [vmem:[#allocation8 + $0x38] sm:$0xff]  ;;  %s1962_s17 = sshll.u32 %s3117_s19, 3  ;;  %s3474_s22 = smov 1  }
  0xf8   : > { %v2195_v6 = vpack.c.bf16 %v546_v4, %v3690_v5  ;;  %v3145_v7 = vld [vmem:[#allocation6] sm:$0xff]  ;;  %v3149_v10 = vld [vmem:[#allocation6 + $0x8] sm:$0xff]  ;;  %v478_v13 = vld [vmem:[#allocation8 + $0x30] sm:$0xff]  ;;  %s3469_s8 = scalar_lea.vmem [#allocation17], %s1962_s17 }
  0xf9   : > { %3765 = vst [vmem:[#allocation24_spill] sm:$0xff] %v3145_v7  ;;  %2093 = vmatprep.mubr.msk.f32.mxu0 %vm547_vm0, %v3145_v7  ;;  %3766 = vst [vmem:[#allocation25_spill] sm:$0xff] %v3149_v10  ;;  %v3157_v14 = vld [vmem:[#allocation6 + $0x18] sm:$0xff]  ;;  %v3159_v15 = vld [vmem:[#allocation6 + $0x20] sm:$0xff] }
  0xfa   : > { %2196 = vmatprep.subr.bf16.mxu0 %v2195_v6  ;;  %3768 = vst [vmem:[#allocation27_spill] sm:$0xff] %v3157_v14  ;;  %3769 = vst [vmem:[#allocation28_spill] sm:$0xff] %v3159_v15  ;;  %v499_v16 = vld [vmem:[#allocation9 + $0x38] sm:$0xff]  ;;  %v498_v17 = vld [vmem:[#allocation9 + $0x30] sm:$0xff] }
  0xfb   : > { %2198 = vmatpush3.bf16.msra.mxu0 %v2195_v6  ;;  %912 = vperm.xlu1 %2430, %v497_v8   ;;  %v3165_v18 = vld [vmem:[#allocation6 + $0x28] sm:$0xff]  ;;  %v3167_v19 = vld [vmem:[#allocation6 + $0x30] sm:$0xff]  ;;  %v480_v21 = vld [vmem:[#allocation8 + $0x40] sm:$0xff] }
  0xfc   : > { %796 = vperm.xlu0 %2429, %v477_v9   ;;  %3770 = vst [vmem:[#allocation29_spill] sm:$0xff] %v3165_v18  ;;  %3771 = vst [vmem:[#allocation30_spill] sm:$0xff] %v3167_v19  ;;  %v481_v20 = vld [vmem:[#allocation8 + $0x48] sm:$0xff]  ;;  %v3173_v22 = vld [vmem:[#allocation6 + $0x38] sm:$0xff] }
  0xfd   : > { %3772 = vst [vmem:[#allocation31_spill] sm:$0xff] %v3173_v22  ;;  %v3175_v23 = vld [vmem:[#allocation6 + $0x40] sm:$0xff]  ;;  %v501_v24 = vld [vmem:[#allocation9 + $0x48] sm:$0xff]  ;;  %v3183_v27 = vld [vmem:[#allocation6 + $0x50] sm:$0xff] }
  0xfe   : > { %2094 = vmatmul.mubr.msk.f32.vlgmr.msra.gmra.mrb[0].mxu0 %vm547_vm0, %v3149_v10  ;;  %3773 = vst [vmem:[#allocation32_spill] sm:$0xff] %v3175_v23  ;;  %v500_v25 = vld [vmem:[#allocation9 + $0x40] sm:$0xff]  ;;  %v3181_v26 = vld [vmem:[#allocation6 + $0x48] sm:$0xff]  ;;  %3775 = vst [vmem:[#allocation34_spill] sm:$0xff] %v3183_v27 }
  0xff   : > { %2096 = vmatprep.mubr.msk.f32.mxu0 %vm547_vm0, %v3151_v11  ;;  %806 = vperm.xlu1 %2430, %v479_v12   ;;  %3774 = vst [vmem:[#allocation33_spill] sm:$0xff] %v3181_v26  ;;  %v483_v28 = vld [vmem:[#allocation8 + $0x58] sm:$0xff]  ;;  %v482_v29 = vld [vmem:[#allocation8 + $0x50] sm:$0xff]  ;;  %v3191_v31 = vld [vmem:[#allocation6 + $0x60] sm:$0xff] }
 0x100   : > { %801 = vperm.xlu0 %2429, %v478_v13   ;;  %v3189_v30 = vld [vmem:[#allocation6 + $0x58] sm:$0xff]  ;;  %3777 = vst [vmem:[#allocation36_spill] sm:$0xff] %v3191_v31  ;;  %v502_v33 = vld [vmem:[#allocation9 + $0x50] sm:$0xff]  ;;  %v3197_v34 = vld [vmem:[#allocation6 + $0x68] sm:$0xff] }
 0x101   : > { %3776 = vst [vmem:[#allocation35_spill] sm:$0xff] %v3189_v30  ;;  %v503_v32 = vld [vmem:[#allocation9 + $0x58] sm:$0xff]  ;;  %3778 = vst [vmem:[#allocation37_spill] sm:$0xff] %v3197_v34  ;;  %v3199_v35 = vld [vmem:[#allocation6 + $0x70] sm:$0xff] }
 0x102   : > { %2097 = vmatmul.mubr.msk.f32.gmra.mrb[2].mxu0 %vm547_vm0, %v3157_v14  ;;  %3779 = vst [vmem:[#allocation38_spill] sm:$0xff] %v3199_v35  ;;  %v485_v36 = vld [vmem:[#allocation8 + $0x68] sm:$0xff]  ;;  %v484_v37 = vld [vmem:[#allocation8 + $0x60] sm:$0xff]  ;;  %v3205_v38 = vld [vmem:[#allocation6 + $0x78] sm:$0xff] }
 0x103   : > { %2099 = vmatprep.mubr.msk.f32.mxu0 %vm547_vm0, %v3159_v15  ;;  %922 = vperm.xlu1 %2430, %v499_v16   ;;  %3780 = vst [vmem:[#allocation39_spill] sm:$0xff] %v3205_v38  ;;  %v3207_v39 = vld [vmem:[#allocation6 + $0x80] sm:$0xff]  ;;  %v505_v40 = vld [vmem:[#allocation9 + $0x68] sm:$0xff]  ;;  %v3215_v43 = vld [vmem:[#allocation6 + $0x90] sm:$0xff] }
 0x104   : > { %917 = vperm.xlu0 %2429, %v498_v17   ;;  %3781 = vst [vmem:[#allocation40_spill] sm:$0xff] %v3207_v39  ;;  %v504_v41 = vld [vmem:[#allocation9 + $0x60] sm:$0xff]  ;;  %v3213_v42 = vld [vmem:[#allocation6 + $0x88] sm:$0xff]  ;;  %3783 = vst [vmem:[#allocation42_spill] sm:$0xff] %v3215_v43 }
 0x105   : > { %3782 = vst [vmem:[#allocation41_spill] sm:$0xff] %v3213_v42  ;;  %v487_v44 = vld [vmem:[#allocation8 + $0x78] sm:$0xff]  ;;  %v486_v45 = vld [vmem:[#allocation8 + $0x70] sm:$0xff]  ;;  %v489_v49 = vld [vmem:[#allocation8 + $0x88] sm:$0xff] }
 0x106   : > { %2100 = vmatmul.mubr.msk.f32.gmra.mrb[4].mxu0 %vm547_vm0, %v3165_v18  ;;  %v3221_v46 = vld [vmem:[#allocation6 + $0x98] sm:$0xff]  ;;  %v506_v48 = vld [vmem:[#allocation9 + $0x70] sm:$0xff]  ;;  %v488_v50 = vld [vmem:[#allocation8 + $0x80] sm:$0xff] }
 0x107   : > { %2102 = vmatprep.mubr.msk.f32.mxu0 %vm547_vm0, %v3167_v19  ;;  %816 = vperm.xlu1 %2430, %v481_v20   ;;  %3784 = vst [vmem:[#allocation43_spill] sm:$0xff] %v3221_v46  ;;  %v507_v47 = vld [vmem:[#allocation9 + $0x78] sm:$0xff]  ;;  %v509_v51 = vld [vmem:[#allocation9 + $0x88] sm:$0xff]  ;;  %v508_v52 = vld [vmem:[#allocation9 + $0x80] sm:$0xff] }
 0x108   : > { %811 = vperm.xlu0 %2429, %v480_v21   ;;  %v491_v53 = vld [vmem:[#allocation8 + $0x98] sm:$0xff]  ;;  %v490_v54 = vld [vmem:[#allocation8 + $0x90] sm:$0xff]  ;;  %v529_v57 = vld [vmem:[#allocation12 + $0x8] sm:$0xff]  ;;  %v3691_v21 = vmov 0.0|0.0  }
 0x109   : > { %v511_v55 = vld [vmem:[#allocation9 + $0x98] sm:$0xff]  ;;  %v510_v56 = vld [vmem:[#allocation9 + $0x90] sm:$0xff]  ;;  %v528_v58 = vld [vmem:[#allocation12] sm:$0xff]  ;;  %2199 = vmatprep.subr.bf16.mxu1 %v3691_v21  ;;  %2227 = vmatprep.subr.bf16.mxu0 %v3691_v21 }
 0x10a   : > { %2103 = vmatmul.mubr.msk.f32.gmra.mrb[6].mxu0 %vm547_vm0, %v3173_v22  ;;  %v537_v59 = vld [vmem:[#allocation14 + $0x8] sm:$0xff]  ;;  %v536_v60 = vld [vmem:[#allocation14] sm:$0xff]  ;;  %v531_v61 = vld [vmem:[#allocation12 + $0x18] sm:$0xff]  ;;  %2200 = vmatpush1.bf16.msra.mxu1 %v3691_v21 }
 0x10b   : > { %2105 = vmatprep.mubr.msk.f32.mxu0 %vm547_vm0, %v3175_v23  ;;  %932 = vperm.xlu1 %2430, %v501_v24   ;;  %v530_v62 = vld [vmem:[#allocation12 + $0x10] sm:$0xff]  ;;  %v539_v63 = vld [vmem:[#allocation14 + $0x18] sm:$0xff]  ;;  %v533_v1 = vld [vmem:[#allocation12 + $0x28] sm:$0xff] }
 0x10c   : > { %927 = vperm.xlu0 %2429, %v500_v25   ;;  %v538_v0 = vld [vmem:[#allocation14 + $0x10] sm:$0xff]  ;;  %v532_v2 = vld [vmem:[#allocation12 + $0x20] sm:$0xff]  ;;  %v541_v3 = vld [vmem:[#allocation14 + $0x28] sm:$0xff]  ;;  %2201 = vmatprep.subr.bf16.mxu1 %v3691_v21 }
 0x10d   : > { %v540_v4 = vld [vmem:[#allocation14 + $0x20] sm:$0xff]  ;;  %v535_v6 = vld [vmem:[#allocation12 + $0x38] sm:$0xff]  ;;  %v534_v8 = vld [vmem:[#allocation12 + $0x30] sm:$0xff] }
 0x10e   : > { %2106 = vmatmul.mubr.msk.f32.gmra.mrb[8].mxu0 %vm547_vm0, %v3181_v26  ;;  %v543_v9 = vld [vmem:[#allocation14 + $0x38] sm:$0xff]  ;;  %v542_v12 = vld [vmem:[#allocation14 + $0x30] sm:$0xff]  ;;  %v472_v16 = vld [vmem:[#allocation8] sm:$0xff]  ;;  %2202 = vmatpush1.bf16.msra.mxu1 %v3691_v21 }
 0x10f   : > { %2108 = vmatprep.mubr.msk.f32.mxu0 %vm547_vm0, %v3183_v27  ;;  %826 = vperm.xlu1 %2430, %v483_v28   ;;  %v545_v13 = vld [vmem:[#allocation2] sm:$0x1]  ;;  %v473_v17 = vld [vmem:[#allocation8 + $0x8] sm:$0xff]  ;;  %v474_v20 = vld [vmem:[#allocation8 + $0x10] sm:$0xff] }
 0x110   : > { %821 = vperm.xlu0 %2429, %v482_v29   ;;  %v475_v24 = vld [vmem:[#allocation8 + $0x18] sm:$0xff]  ;;  %v492_v25 = vld [vmem:[#allocation9] sm:$0xff]  ;;  %v493_v28 = vld [vmem:[#allocation9 + $0x8] sm:$0xff]  ;;  %2203 = vmatprep.subr.bf16.mxu1 %v3691_v21 }
 0x111   : > { %v494_v29 = vld [vmem:[#allocation9 + $0x10] sm:$0xff] }
 0x112   : > { %2109 = vmatmul.mubr.msk.f32.gmra.mrb[10].mxu0 %vm547_vm0, %v3189_v30 }
 0x113   : > { %2111 = vmatprep.mubr.msk.f32.mxu0 %vm547_vm0, %v3191_v31  ;;  %942 = vperm.xlu1 %2430, %v503_v32   ;;  %v495_v32 = vld [vmem:[#allocation9 + $0x18] sm:$0xff] }
 0x114   : > { %937 = vperm.xlu0 %2429, %v502_v33  }
 0x116   : > { %2112 = vmatmul.mubr.msk.f32.gmra.mrb[12].mxu0 %vm547_vm0, %v3197_v34 }
 0x117   : > { %2114 = vmatprep.mubr.msk.f32.mxu0 %vm547_vm0, %v3199_v35  ;;  %836 = vperm.xlu1 %2430, %v485_v36  }
 0x118   : > { %831 = vperm.xlu0 %2429, %v484_v37  }
 0x11a   : > { %2115 = vmatmul.mubr.msk.f32.gmra.mrb[14].mxu0 %vm547_vm0, %v3205_v38 }
 0x11b   : > { %2117 = vmatprep.mubr.msk.f32.mxu0 %vm547_vm0, %v3207_v39  ;;  %952 = vperm.xlu1 %2430, %v505_v40  }
 0x11c   : > { %947 = vperm.xlu0 %2429, %v504_v41  }
 0x11e   : > { %2118 = vmatmul.mubr.msk.f32.gmra.mrb[16].mxu0 %vm547_vm0, %v3213_v42 }
 0x11f   : > { %2120 = vmatprep.mubr.msk.f32.mxu0 %vm547_vm0, %v3215_v43  ;;  %846 = vperm.xlu1 %2430, %v487_v44  }
 0x120   : > { %841 = vperm.xlu0 %2429, %v486_v45   ;;  %v3243_v45 = vld [vmem:[#allocation11 + $0x8] sm:$0xff] }
 0x121   : > { %3791 = vst [vmem:[#allocation50_spill] sm:$0xff] %v3243_v45  ;;  %1983 = vmatprep.mubr.msk.f32.mxu1 %vm1017_vm1, %v3243_v45 }
 0x122   : > { %2121 = vmatmul.mubr.msk.f32.gmra.mrb[18].mxu0 %vm547_vm0, %v3221_v46 }
 0x123   : > { %962 = vperm.xlu1 %2430, %v507_v47  }
 0x124   : > { %957 = vperm.xlu0 %2429, %v506_v48  }
 0x127   : > { %856 = vperm.xlu1 %2430, %v489_v49  }
 0x128   : > { %851 = vperm.xlu0 %2429, %v488_v50  }
 0x12b   : > { %972 = vperm.xlu1 %2430, %v509_v51  }
 0x12c   : > { %967 = vperm.xlu0 %2429, %v508_v52  }
 0x12f   : > { %866 = vperm.xlu1 %2430, %v491_v53  }
 0x130   : > { %861 = vperm.xlu0 %2429, %v490_v54  }
 0x133   : > { %982 = vperm.xlu1 %2430, %v511_v55  }
 0x134   : > { %977 = vperm.xlu0 %2429, %v510_v56  }
 0x137   : > { %1154 = vperm.xlu1 %2430, %v529_v57  }
 0x138   : > { %1149 = vperm.xlu0 %2429, %v528_v58  }
 0x13b   : > { %1202 = vperm.xlu1 %2430, %v537_v59  }
 0x13c   : > { %1197 = vperm.xlu0 %2429, %v536_v60  }
 0x13f   : > { %1164 = vperm.xlu1 %2430, %v531_v61  }
 0x140   : > { %1159 = vperm.xlu0 %2429, %v530_v62  }
 0x143   : > { %1212 = vperm.xlu1 %2430, %v539_v63  }
 0x144   : > { %1207 = vperm.xlu0 %2429, %v538_v0  }
 0x147   : > { %1174 = vperm.xlu1 %2430, %v533_v1  }
 0x148   : > { %1169 = vperm.xlu0 %2429, %v532_v2  }
 0x14b   : > { %1222 = vperm.xlu1 %2430, %v541_v3  }
 0x14c   : > { %1217 = vperm.xlu0 %2429, %v540_v4  }
 0x14f   : > { %1184 = vperm.xlu1 %2430, %v535_v6  }
 0x150   : > { %1179 = vperm.xlu0 %2429, %v534_v8  }
 0x153   : > { %1232 = vperm.xlu1 %2430, %v543_v9  }
 0x154   : > { %1227 = vperm.xlu0 %2429, %v542_v12  }
 0x157   : > { %771 = vperm.xlu1 %2430, %v472_v16  }
 0x158   : > { %1327 = vperm.xlu0 %2429, %v545_v13  }
 0x15b   : > { %781 = vperm.xlu1 %2430, %v474_v20  }
 0x15c   : > { %776 = vperm.xlu0 %2429, %v473_v17  }
 0x15f   : > { %887 = vperm.xlu1 %2430, %v492_v25  }
 0x160   : > { %786 = vperm.xlu0 %2429, %v475_v24  }
 0x163   : > { %897 = vperm.xlu1 %2430, %v494_v29  }
 0x164   : > { %892 = vperm.xlu0 %2429, %v493_v28  }
 0x168   : > { %902 = vperm.xlu0 %2429, %v495_v32  }
 0x176   : > { %v3231_v33 = vpop.permute.xlu1 %907  ;;  %v3233_v36 = vpop.permute.xlu0 %791 }
 0x177   : > { %3785 = vst [vmem:[#allocation44_spill] sm:$0xff] %v3231_v33  ;;  %3786 = vst [vmem:[#allocation45_spill] sm:$0xff] %v3233_v36 }
 0x17a   : > { %v3235_v37 = vpop.permute.xlu1 %912 }
 0x17b   : > { %3787 = vst [vmem:[#allocation46_spill] sm:$0xff] %v3235_v37  ;;  %v3237_v40 = vpop.permute.xlu0 %796 }
 0x17c   : > { %3788 = vst [vmem:[#allocation47_spill] sm:$0xff] %v3237_v40 }
 0x17e   : > { %v3239_v41 = vpop.permute.xlu1 %806 }
 0x17f   : > { %3789 = vst [vmem:[#allocation48_spill] sm:$0xff] %v3239_v41  ;;  %v3241_v44 = vpop.permute.xlu0 %801 }
 0x180   : > { %3790 = vst [vmem:[#allocation49_spill] sm:$0xff] %v3241_v44 }
 0x182   : > { %v3247_v47 = vpop.permute.xlu1 %922 }
 0x183   : > { %v3249_v48 = vpop.permute.xlu0 %917 }
 0x186   : > { %v3251_v49 = vpop.permute.xlu1 %816 }
 0x187   : > { %v3253_v50 = vpop.permute.xlu0 %811 }
 0x188   : > { %3792 = vst [vmem:[#allocation51_spill] sm:$0xff] %v3253_v50 }
 0x18a   : > { %v3255_v51 = vpop.permute.xlu1 %932 }
 0x18b   : > { %3793 = vst [vmem:[#allocation52_spill] sm:$0xff] %v3255_v51  ;;  %v3257_v52 = vpop.permute.xlu0 %927 }
 0x18c   : > { %3794 = vst [vmem:[#allocation53_spill] sm:$0xff] %v3257_v52 }
 0x18e   : > { %v3259_v53 = vpop.permute.xlu1 %826 }
 0x18f   : > { %v3261_v54 = vpop.permute.xlu0 %821 }
 0x192   : > { %v3263_v55 = vpop.permute.xlu1 %942 }
 0x193   : > { %3795 = vst [vmem:[#allocation54_spill] sm:$0xff] %v3263_v55  ;;  %v3265_v56 = vpop.permute.xlu0 %937 }
 0x196   : > { %v3267_v57 = vpop.permute.xlu1 %836 }
 0x197   : > { %v3269_v58 = vpop.permute.xlu0 %831 }
 0x19a   : > { %v3271_v59 = vpop.permute.xlu1 %952 }
 0x19b   : > { %v3273_v60 = vpop.permute.xlu0 %947 }
 0x19e   : > { %v3275_v61 = vpop.permute.xlu1 %846 }
 0x19f   : > { %v3277_v62 = vpop.permute.xlu0 %841 }
 0x1a2   : > { %v3279_v63 = vpop.permute.xlu1 %962 }
 0x1a3   : > { %v3281_v0 = vpop.permute.xlu0 %957 }
 0x1a6   : > { %v3283_v1 = vpop.permute.xlu1 %856 }
 0x1a7   : > { %v3285_v2 = vpop.permute.xlu0 %851 }
 0x1aa   : > { %v3287_v3 = vpop.permute.xlu1 %972 }
 0x1ab   : > { %v3289_v4 = vpop.permute.xlu0 %967 }
 0x1ae   : > { %v3291_v6 = vpop.permute.xlu1 %866 }
 0x1af   : > { %v3293_v8 = vpop.permute.xlu0 %861 }
 0x1b2   : > { %v3295_v9 = vpop.permute.xlu1 %982 }
 0x1b3   : > { %v3297_v12 = vpop.permute.xlu0 %977 }
 0x1b6   : > { %v3299_v13 = vpop.permute.xlu1 %1154 }
 0x1b7   : > { %v3301_v16 = vpop.permute.xlu0 %1149 }
 0x1ba   : > { %v3303_v17 = vpop.permute.xlu1 %1202 }
 0x1bb   : > { %v3305_v20 = vpop.permute.xlu0 %1197 }
 0x1be   : > { %v3307_v24 = vpop.permute.xlu1 %1164 }
 0x1bf   : > { %v3309_v25 = vpop.permute.xlu0 %1159 }
 0x1c2   : > { %v3311_v28 = vpop.permute.xlu1 %1212 }
 0x1c3   : > { %v3313_v29 = vpop.permute.xlu0 %1207 }
 0x1c6   : > { %v3315_v32 = vpop.permute.xlu1 %1174 }
 0x1c7   : > { %v3317_v5 = vpop.permute.xlu0 %1169 }
 0x1ca   : > { %v3319_v21 = vpop.permute.xlu1 %1222 }
 0x1cb   : > { %v3321_v46 = vpop.permute.xlu0 %1217 }
 0x1ce   : > { %v3323_v43 = vpop.permute.xlu1 %1184 }
 0x1cf   : > { %v3325_v42 = vpop.permute.xlu0 %1179 }
 0x1d1   : > { %v2095_v39 = vpop.f32.mrb[0].mxu0 }
 0x1d2   : > { %v674_v38 = vpop.f32.mrb[1].mxu0  ;;  %v3327_v35 = vpop.permute.xlu1 %1232 }
 0x1d3   : > { %v3329_v34 = vpop.permute.xlu0 %1227 }
 0x1d5   : > { %v2098_v31 = vpop.f32.mrb[2].mxu0 }
 0x1d6   : > { %v682_v30 = vpop.f32.mrb[3].mxu0  ;;  %v3333_v26 = vpop.permute.xlu1 %771 }
 0x1d7   : > { %v3331_v27 = vpop.permute.xlu0 %1327  ;;  %3796 = vst [vmem:[#allocation55_spill] sm:$0xff] %v3333_v26 }
 0x1d9   : > { %v2101_v23 = vpop.f32.mrb[4].mxu0 }
 0x1da   : > { %v870_v22 = vmul.f32 %v2101_v23, %v3237_v40  ;;  %v690_v19 = vpop.f32.mrb[5].mxu0  ;;  %v3339_v39 = vpop.permute.xlu1 %781 }
 0x1db   : > { %v869_v18 = vmul.f32 %v3233_v36, %v690_v19  ;;  %v3337_v15 = vpop.permute.xlu0 %776  ;;  %3798 = vst [vmem:[#allocation57_spill] sm:$0xff] %v3339_v39 }
 0x1dc   : > { %3797 = vst [vmem:[#allocation56_spill] sm:$0xff] %v3337_v15  ;;  %v986_v38 = vadd.f32 %v3235_v37, %v870_v22 }
 0x1dd   : > { %v985_v14 = vadd.f32 %v3231_v33, %v869_v18  ;;  %v2104_v31 = vpop.f32.mrb[6].mxu0 }
 0x1de   : > { %v1002_v30 = vmax.f32 %v986_v38, 0.0  ;;  %v872_v11 = vmul.f32 %v2104_v31, %v3239_v41  ;;  %v700_v10 = vpop.f32.mrb[7].mxu0  ;;  %v3347_v40 = vpop.permute.xlu1 %887  ;;  %v3803_v41 = vmov 0.0|0.0  }
 0x1df   : > { %v1001_v26 = vmax.f32 %v985_v14, 0.0  ;;  %v871_v45 = vmul.f32 %v3241_v44, %v700_v10  ;;  %v3345_v23 = vpop.permute.xlu0 %786  ;;  %3800 = vst [vmem:[#allocation59_spill] sm:$0xff] %v3347_v40 }
 0x1e0   : > { %3799 = vst [vmem:[#allocation58_spill] sm:$0xff] %v3345_v23  ;;  %v988_v19 = vadd.f32 %v3247_v47, %v872_v11 }
 0x1e1   : > { %v987_v36 = vadd.f32 %v3249_v48, %v871_v45  ;;  %v2107_v39 = vpop.f32.mrb[8].mxu0  ;;  %v2204_v22 = vpack.c.bf16 %v1002_v30, %v1001_v26 }
 0x1e2   : > { %v1004_v37 = vmax.f32 %v988_v19, 0.0  ;;  %v874_v18 = vmul.f32 %v2107_v39, %v3251_v49  ;;  %v710_v38 = vpop.f32.mrb[9].mxu0  ;;  %v3355_v10 = vpop.permute.xlu1 %897 }
 0x1e3   : > { %v1003_v33 = vmax.f32 %v987_v36, 0.0  ;;  %v873_v31 = vmul.f32 %v3253_v50, %v710_v38  ;;  %v3353_v14 = vpop.permute.xlu0 %892  ;;  %3802 = vst [vmem:[#allocation61_spill] sm:$0xff] %v3355_v10  ;;  %2205 = vmatpush1.bf16.msra.mxu1 %v2204_v22 }
 0x1e4   : > { %3801 = vst [vmem:[#allocation60_spill] sm:$0xff] %v3353_v14  ;;  %v990_v44 = vadd.f32 %v3255_v51, %v874_v18  ;;  %2206 = vmatprep.subr.bf16.mxu1 %v3803_v41 }
 0x1e5   : > { %v989_v11 = vadd.f32 %v3257_v52, %v873_v31  ;;  %v2110_v45 = vpop.f32.mrb[10].mxu0  ;;  %v2207_v26 = vpack.c.bf16 %v1004_v37, %v1003_v33 }
 0x1e6   : > { %v1006_v30 = vmax.f32 %v990_v44, 0.0  ;;  %v876_v39 = vmul.f32 %v2110_v45, %v3259_v53  ;;  %v720_v19 = vpop.f32.mrb[11].mxu0 }
 0x1e7   : > { %v1005_v36 = vmax.f32 %v989_v11, 0.0  ;;  %v875_v38 = vmul.f32 %v3261_v54, %v720_v19  ;;  %v3362_v50 = vpop.permute.xlu0 %902  ;;  %2208 = vmatpush1.bf16.msra.mxu1 %v2207_v26 }
 0x1e8   : > { %3804 = vst [vmem:[#allocation62_spill] sm:$0xff] %v3362_v50  ;;  %v992_v22 = vadd.f32 %v3263_v55, %v876_v39  ;;  %2209 = vmatprep.subr.bf16.mxu1 %v3803_v41 }
 0x1e9   : > { %v991_v18 = vadd.f32 %v3265_v56, %v875_v38  ;;  %v2113_v51 = vpop.f32.mrb[12].mxu0  ;;  %v2210_v31 = vpack.c.bf16 %v1006_v30, %v1005_v36 }
 0x1ea   : > { %v1008_v52 = vmax.f32 %v992_v22, 0.0  ;;  %v878_v33 = vmul.f32 %v2113_v51, %v3267_v57  ;;  %v730_v37 = vpop.f32.mrb[13].mxu0 }
 0x1eb   : > { %v1007_v44 = vmax.f32 %v991_v18, 0.0  ;;  %v877_v11 = vmul.f32 %v3269_v58, %v730_v37  ;;  %2211 = vmatpush1.bf16.msra.mxu1 %v2210_v31 }
 0x1ec   : > { %v994_v45 = vadd.f32 %v3271_v59, %v878_v33  ;;  %2212 = vmatprep.subr.bf16.mxu1 %v3803_v41 }
 0x1ed   : > { %v993_v26 = vadd.f32 %v3273_v60, %v877_v11  ;;  %v2116_v39 = vpop.f32.mrb[14].mxu0  ;;  %v2213_v19 = vpack.c.bf16 %v1008_v52, %v1007_v44 }
 0x1ee   : > { %v1010_v55 = vmax.f32 %v994_v45, 0.0  ;;  %v880_v38 = vmul.f32 %v2116_v39, %v3275_v61  ;;  %v740_v30 = vpop.f32.mrb[15].mxu0 }
 0x1ef   : > { %v1009_v36 = vmax.f32 %v993_v26, 0.0  ;;  %v879_v51 = vmul.f32 %v3277_v62, %v740_v30  ;;  %2214 = vmatpush1.bf16.msra.mxu1 %v2213_v19 }
 0x1f0   : > { %v996_v22 = vadd.f32 %v3279_v63, %v880_v38  ;;  %2215 = vmatprep.subr.bf16.mxu1 %v3803_v41 }
 0x1f1   : > { %v995_v18 = vadd.f32 %v3281_v0, %v879_v51  ;;  %v2119_v31 = vpop.f32.mrb[16].mxu0  ;;  %v2216_v33 = vpack.c.bf16 %v1010_v55, %v1009_v36 }
 0x1f2   : > { %v1012_v37 = vmax.f32 %v996_v22, 0.0  ;;  %v882_v11 = vmul.f32 %v2119_v31, %v3283_v1  ;;  %v750_v52 = vpop.f32.mrb[17].mxu0 }
 0x1f3   : > { %v1011_v44 = vmax.f32 %v995_v18, 0.0  ;;  %v881_v45 = vmul.f32 %v3285_v2, %v750_v52  ;;  %2217 = vmatpush1.bf16.msra.mxu1 %v2216_v33 }
 0x1f4   : > { %v998_v26 = vadd.f32 %v3287_v3, %v882_v11  ;;  %2218 = vmatprep.subr.bf16.mxu1 %v3803_v41 }
 0x1f5   : > { %v997_v39 = vadd.f32 %v3289_v4, %v881_v45  ;;  %v2122_v19 = vpop.f32.mrb[18].mxu0  ;;  %v2219_v38 = vpack.c.bf16 %v1012_v37, %v1011_v44  ;;  %v3388_v44 = vld [vmem:[#allocation11] sm:$0xff]  ;;  %v3390_v45 = vld [vmem:[#allocation11 + $0x18] sm:$0xff] }
 0x1f6   : > { %v1014_v30 = vmax.f32 %v998_v26, 0.0  ;;  %v884_v51 = vmul.f32 %v2122_v19, %v3291_v6  ;;  %v760_v55 = vpop.f32.mrb[19].mxu0  ;;  %3805 = vst [vmem:[#allocation63_spill] sm:$0xff] %v3390_v45  ;;  %v3395_v26 = vld [vmem:[#allocation11 + $0x10] sm:$0xff]  ;;  %v3402_v19 = vld [vmem:[#allocation11 + $0x20] sm:$0xff] }
 0x1f7   : > { %v1013_v36 = vmax.f32 %v997_v39, 0.0  ;;  %v883_v22 = vmul.f32 %v3293_v8, %v760_v55  ;;  %2220 = vmatpush1.bf16.msra.mxu1 %v2219_v38  ;;  %3806 = vst [vmem:[#allocation64_spill] sm:$0xff] %v3395_v26  ;;  %v3397_v39 = vld [vmem:[#allocation11 + $0x28] sm:$0xff]  ;;  %3808 = vst [vmem:[#allocation66_spill] sm:$0xff] %v3402_v19  ;;  %v3404_v38 = vld [vmem:[#allocation11 + $0x38] sm:$0xff] }
 0x1f8   : > { %v1000_v18 = vadd.f32 %v3295_v9, %v884_v51  ;;  %2221 = vmatprep.subr.bf16.mxu1 %v3803_v41  ;;  %3807 = vst [vmem:[#allocation65_spill] sm:$0xff] %v3397_v39  ;;  %3809 = vst [vmem:[#allocation67_spill] sm:$0xff] %v3404_v38  ;;  %v3411_v51 = vld [vmem:[#allocation11 + $0x48] sm:$0xff]  ;;  %v3416_v55 = vld [vmem:[#allocation11 + $0x40] sm:$0xff] }
 0x1f9   : > { %v999_v31 = vadd.f32 %v3297_v12, %v883_v22  ;;  %v2222_v33 = vpack.c.bf16 %v1014_v30, %v1013_v36  ;;  %v3409_v30 = vld [vmem:[#allocation11 + $0x30] sm:$0xff]  ;;  %3811 = vst [vmem:[#allocation69_spill] sm:$0xff] %v3411_v51  ;;  %3812 = vst [vmem:[#allocation70_spill] sm:$0xff] %v3416_v55  ;;  %v3418_v36 = vld [vmem:[#allocation11 + $0x58] sm:$0xff] }
 0x1fa   : > { %v1016_v11 = vmax.f32 %v1000_v18, 0.0  ;;  %3810 = vst [vmem:[#allocation68_spill] sm:$0xff] %v3409_v30  ;;  %3813 = vst [vmem:[#allocation71_spill] sm:$0xff] %v3418_v36  ;;  %v3423_v22 = vld [vmem:[#allocation11 + $0x50] sm:$0xff]  ;;  %v3425_v18 = vld [vmem:[#allocation11 + $0x68] sm:$0xff] }
 0x1fb   : > { %v1015_v52 = vmax.f32 %v999_v31, 0.0  ;;  %2223 = vmatpush1.bf16.msra.mxu1 %v2222_v33  ;;  %3814 = vst [vmem:[#allocation72_spill] sm:$0xff] %v3423_v22  ;;  %3815 = vst [vmem:[#allocation73_spill] sm:$0xff] %v3425_v18  ;;  %v3430_v31 = vld [vmem:[#allocation11 + $0x60] sm:$0xff]  ;;  %v3432_v33 = vld [vmem:[#allocation11 + $0x78] sm:$0xff] }
 0x1fc   : > { %2224 = vmatprep.subr.bf16.mxu1 %v3803_v41  ;;  %3816 = vst [vmem:[#allocation74_spill] sm:$0xff] %v3430_v31  ;;  %3817 = vst [vmem:[#allocation75_spill] sm:$0xff] %v3432_v33 }
 0x1fd   : > { %v2225_v37 = vpack.c.bf16 %v1016_v11, %v1015_v52  ;;  %v3437_v11 = vld [vmem:[#allocation11 + $0x70] sm:$0xff]  ;;  %v3819_v52 = vmov 0.0  }
 0x1fe   : > { %3818 = vst [vmem:[#allocation76_spill] sm:$0xff] %v3437_v11  ;;  %2139 = vmatprep.mubr.msk.f32.mxu0 %vm2772_vm2, %v3819_v52 }
 0x1ff   : > { %2226 = vmatpush1.bf16.msra.mxu1 %v2225_v37 }
 0x202   : > { %1107 = vmatmul.mubr.f32.vlgmr.msra.gmra.mrb[0].mxu1 %v3388_v44 }
 0x203   : > { %1984 = vmatprep.mubr.msk.f32.mxu1 %vm1017_vm1, %v3390_v45 }
 0x206   : > { %1112 = vmatmul.mubr.f32.gmra.mrb[2].mxu1 %v3395_v26 }
 0x207   : > { %1985 = vmatprep.mubr.msk.f32.mxu1 %vm1017_vm1, %v3397_v39 }
 0x20a   : > { %1117 = vmatmul.mubr.f32.gmra.mrb[4].mxu1 %v3402_v19 }
 0x20b   : > { %1986 = vmatprep.mubr.msk.f32.mxu1 %vm1017_vm1, %v3404_v38 }
 0x20e   : > { %1122 = vmatmul.mubr.f32.gmra.mrb[6].mxu1 %v3409_v30 }
 0x20f   : > { %1987 = vmatprep.mubr.msk.f32.mxu1 %vm1017_vm1, %v3411_v51 }
 0x212   : > { %1127 = vmatmul.mubr.f32.gmra.mrb[8].mxu1 %v3416_v55 }
 0x213   : > { %1988 = vmatprep.mubr.msk.f32.mxu1 %vm1017_vm1, %v3418_v36 }
 0x216   : > { %1132 = vmatmul.mubr.f32.gmra.mrb[10].mxu1 %v3423_v22 }
 0x217   : > { %1989 = vmatprep.mubr.msk.f32.mxu1 %vm1017_vm1, %v3425_v18 }
 0x21a   : > { %1137 = vmatmul.mubr.f32.gmra.mrb[12].mxu1 %v3430_v31 }
 0x21b   : > { %1990 = vmatprep.mubr.msk.f32.mxu1 %vm1017_vm1, %v3432_v33 }
 0x21e   : > { %1142 = vmatmul.mubr.f32.gmra.mrb[14].mxu1 %v3437_v11 }
 0x2d5   : > { %v1108_v37 = vpop.f32.mrb[0].mxu1 }
 0x2d6   : > { %v1187_v22 = vmul.f32 %v3301_v16, %v1108_v37  ;;  %v1110_v18 = vpop.f32.mrb[1].mxu1 }
 0x2d8   : > { %v1235_v55 = vadd.f32 %v3305_v20, %v1187_v22 }
 0x2d9   : > { %v1113_v36 = vpop.f32.mrb[2].mxu1 }
 0x2da   : > { %v1188_v51 = vmul.f32 %v3299_v13, %v1113_v36  ;;  %v1115_v31 = vpop.f32.mrb[3].mxu1  ;;  %v1243_v38 = vmax.f32 %v1235_v55, 0.0 }
 0x2dc   : > { %v1236_v30 = vadd.f32 %v3303_v17, %v1188_v51 }
 0x2dd   : > { %v1118_v33 = vpop.f32.mrb[4].mxu1 }
 0x2de   : > { %v1244_v19 = vmax.f32 %v1236_v30, 0.0  ;;  %v1189_v11 = vmul.f32 %v3309_v25, %v1118_v33  ;;  %v1120_v39 = vpop.f32.mrb[5].mxu1 }
 0x2e0   : > { %v2228_v26 = vpack.c.bf16 %v1244_v19, %v1243_v38  ;;  %v1237_v45 = vadd.f32 %v3313_v29, %v1189_v11 }
 0x2e1   : > { %v1123_v52 = vpop.f32.mrb[6].mxu1 }
 0x2e2   : > { %v1190_v18 = vmul.f32 %v3307_v24, %v1123_v52  ;;  %2229 = vmatpush3.bf16.msra.mxu0 %v2228_v26  ;;  %v1125_v37 = vpop.f32.mrb[7].mxu1  ;;  %v1245_v51 = vmax.f32 %v1237_v45, 0.0 }
 0x2e3   : > { %2230 = vmatprep.subr.bf16.mxu0 %v3803_v41 }
 0x2e4   : > { %v1238_v36 = vadd.f32 %v3311_v28, %v1190_v18 }
 0x2e5   : > { %v1128_v22 = vpop.f32.mrb[8].mxu1 }
 0x2e6   : > { %v1246_v31 = vmax.f32 %v1238_v36, 0.0  ;;  %v1191_v30 = vmul.f32 %v3317_v5, %v1128_v22  ;;  %v1130_v55 = vpop.f32.mrb[9].mxu1 }
 0x2e8   : > { %v2231_v33 = vpack.c.bf16 %v1246_v31, %v1245_v51  ;;  %v1239_v19 = vadd.f32 %v3321_v46, %v1191_v30 }
 0x2e9   : > { %v1133_v39 = vpop.f32.mrb[10].mxu1 }
 0x2ea   : > { %v1192_v38 = vmul.f32 %v3315_v32, %v1133_v39  ;;  %2232 = vmatpush3.bf16.msra.mxu0 %v2231_v33  ;;  %v1135_v11 = vpop.f32.mrb[11].mxu1  ;;  %v1247_v18 = vmax.f32 %v1239_v19, 0.0 }
 0x2eb   : > { %2233 = vmatprep.subr.bf16.mxu0 %v3803_v41  ;;  %v3460_v11 = vld [vmem:[#allocation15] sm:$0xff] }
 0x2ec   : > { %v1240_v26 = vadd.f32 %v3319_v21, %v1192_v38 }
 0x2ed   : > { %v1138_v52 = vpop.f32.mrb[12].mxu1 }
 0x2ee   : > { %v1248_v37 = vmax.f32 %v1240_v26, 0.0  ;;  %v1193_v45 = vmul.f32 %v3325_v42, %v1138_v52  ;;  %v1140_v36 = vpop.f32.mrb[13].mxu1  ;;  %v1330_v26 = vlaneseq }
 0x2f0   : > { %v2234_v22 = vpack.c.bf16 %v1248_v37, %v1247_v18  ;;  %v1241_v51 = vadd.f32 %v3329_v34, %v1193_v45  ;;  %v1331_v52 = vshrl.u32 %v1330_v26, 7 }
 0x2f1   : > { %v1143_v55 = vpop.f32.mrb[14].mxu1 }
 0x2f2   : > { %v1194_v31 = vmul.f32 %v3323_v43, %v1143_v55  ;;  %2235 = vmatpush3.bf16.msra.mxu0 %v2234_v22  ;;  %v1145_v30 = vpop.f32.mrb[15].mxu1  ;;  %v1249_v39 = vmax.f32 %v1241_v51, 0.0  ;;  %v1332_v18 = vsub.s32 0, %v1331_v52 }
 0x2f3   : > { %2236 = vmatprep.subr.bf16.mxu0 %v3803_v41 }
 0x2f4   : > { %v1242_v33 = vadd.f32 %v3327_v35, %v1194_v31  ;;  %v3466_v37 = vrot.slane %v3331_v27, %v1332_v18 }
 0x2f6   : > { %v1250_v38 = vmax.f32 %v1242_v33, 0.0  ;;  %3820 = vst [vmem:[#allocation77_spill] sm:$0xff] %v3466_v37 }
 0x2f8   : > { %v2237_v19 = vpack.c.bf16 %v1250_v38, %v1249_v39 }
 0x2fa   : > { %2238 = vmatpush3.bf16.msra.mxu0 %v2237_v19 }
 0x2fd   : > { %2140 = vmatmul.mubr.msk.f32.vlgmr.msra.gmra.mrb[20].mxu0 %vm1251_vm3, %v3460_v11 }
 0x3d0   : > { %v1321_v41 = vpop.f32.mrb[20].mxu0  }
 0x3d1   : > { %v1334_v45 = vadd.f32 %v3466_v37, %v1321_v41  ;;  %v2141_v36 = vpop.f32.mrb[21].mxu0 }
 0x3d3   : > { %1335 = vst [vmem:[%s3469_s8] sm:$0x1] %v1334_v45 }
 0x3d4 LB: >> { %v3821_v7 = vld [vmem:[#allocation24_spill] sm:$0xff]  ;;  %v3822_v27 = vld [vmem:[#allocation50_spill] sm:$0xff]  ;;  %s1992_s21 = sadd.s32 4294967295, %s2755_s22  ;;  %v3823_v31 = vld [vmem:[#allocation25_spill] sm:$0xff]  ;;  %vm2774_vm4 = vmmov 0   ;;  %s1777_s28 = scalar_lea.vmem %s3469_s8, %s2755_s22 [#allocation17]  ;;  %s2755_s22 = sphi %s3474_s22, %s1341_s22   ;;  %v2751_v41 = vphi %v1321_v41, %v1768_v41  }
 0x3d5   : >> { %2146 = vmatprep.mubr.msk.f32.mxu0 %vm547_vm0, %v3821_v7  ;;  %2014 = vmatprep.mubr.msk.f32.mxu1 %vm1017_vm1, %v3822_v27  ;;  %s1993_s25 = sshll.u32 %s1992_s21, 3  ;;  %v3824_v30 = vld [vmem:[#allocation26_spill] sm:$0xff]  ;;  %v3825_v33 = vld [vmem:[#allocation27_spill] sm:$0xff]  ;;  %v3826_v39 = vld [vmem:[#allocation28_spill] sm:$0xff]  ;;  %s1341_s22 = sadd.s32 1, %s2755_s22  }
 0x3d6   : >> { %s1345_s2 = scalar_lea.vmem %s3121_s30, %s1993_s25 [#allocation3]  ;;  %v3827_v38 = vld [vmem:[#allocation29_spill] sm:$0xff]  ;;  %v3828_v19 = vld [vmem:[#allocation30_spill] sm:$0xff]  ;;  %v3829_v26 = vld [vmem:[#allocation31_spill] sm:$0xff]  ;;  %p1338_p12 = scmp.ge.s32.totalorder %s1341_s22, 8  }
 0x3d7   : >> { %v1346_v22 = vld [vmem:[%s1345_s2] sm:$0xff]  ;;  %v1347_v55 = vld [vmem:[%s1345_s2 + $0x8] sm:$0xff]  ;;  %v3833_v36 = vld [vmem:[#allocation35_spill] sm:$0xff]  ;;  %s2024_s18 = sshll.u32 (%p1338_p12), %s2851_s16, 7  ;;  %s1793_s26 = sshll.u32 (%p1338_p12), %s3469_s8, 4  ;;  %s1794_s26 = int_to_ptr.vmem [resolvable:$true] %s1793_s26 }
 0x3d8   : >> { %v2239_v51 = vpack.c.bf16 %v1347_v55, %v1346_v22  ;;  %v3830_v52 = vld [vmem:[#allocation32_spill] sm:$0xff]  ;;  %v3831_v18 = vld [vmem:[#allocation33_spill] sm:$0xff]  ;;  %v3832_v45 = vld [vmem:[#allocation34_spill] sm:$0xff]  ;;  %s3633_s24 = scalar_lea.hbm (%p1338_p12), %s3681_s9, %s2024_s18  ;;  %s1780_s23 = scalar_lea.sflag (%p1338_p12), [#allocation5], %s3117_s19 }
 0x3d9   : >> { %v3834_v27 = vld [vmem:[#allocation36_spill] sm:$0xff]  ;;  %v3835_v22 = vld [vmem:[#allocation37_spill] sm:$0xff]  ;;  %v3836_v55 = vld [vmem:[#allocation38_spill] sm:$0xff]  ;;  %s2657_s17 = scalar_lea.vmem (%p1338_p12), %s1794_s26, 128  ;;  %p3876_p13 = scmp.ne.s32.totalorder (%p1338_p12), %s3752_s29, 0 }
 0x3da   : >> { %2240 = vmatprep.subr.bf16.mxu0 %v2239_v51  ;;  %v3842_v15 = vld [vmem:[#allocation56_spill] sm:$0xff]  ;;  %v3845_v40 = vld [vmem:[#allocation59_spill] sm:$0xff]  ;;  %v3846_v23 = vld [vmem:[#allocation58_spill] sm:$0xff]  ;;  %p2658_p1 = scmp.ne.s32.totalorder (%p1338_p12), %s1794_s26, %s2657_s17  ;;  %s2776_s22 = smov (%p1338_p12), [#allocation17]  }
 0x3db   : >> { %2242 = vmatpush3.bf16.msra.mxu0 %v2239_v51  ;;  %v3837_v51 = vld [vmem:[#allocation39_spill] sm:$0xff]  ;;  %v3844_v14 = vld [vmem:[#allocation60_spill] sm:$0xff]  ;;  %v3848_v50 = vld [vmem:[#allocation62_spill] sm:$0xff]  ;;  %s2661_s21 = sshll.u32 (%p1338_p12), %s2776_s22, 4  ;;  %s2662_s21 = int_to_ptr.vmem [resolvable:$false] %s2661_s21 }
 0x3dc   : >> { %v3849_v10 = vld [vmem:[#allocation61_spill] sm:$0xff]  ;;  %p2659_p0 = pnand (%p1338_p12), %p2658_p1, %p3876_p13  ;;  %s2663_s30 = scalar_lea.vmem (%p1338_p12), %s2662_s21, 256 }
 0x3dd   : > { %p2664_p8 = scmp.lt.s32.totalorder (%p1338_p12), %s1794_s26, %s2662_s21  ;;  %p2665_p6 = scmp.lt.s32.totalorder (%p1338_p12), %s2663_s30, %s2657_s17 }
 0x3de   : >> { %2147 = vmatmul.mubr.msk.f32.vlgmr.msra.gmra.mrb[0].mxu0 %vm547_vm0, %v3823_v31  ;;  %v3838_v31 = vld [vmem:[#allocation40_spill] sm:$0xff]  ;;  %p2660_p2 = pneg (%p1338_p12), %p2659_p0 }
 0x3df   : >> { %2149 = vmatprep.mubr.msk.f32.mxu0 %vm547_vm0, %v3824_v30  ;;  %v3839_v30 = vld [vmem:[#allocation41_spill] sm:$0xff]  ;;  %p2666_p10 = por (%p1338_p12), %p2665_p6, %p2664_p8 }
 0x3e1   : > { %p2667_p11 = pnand (%p1338_p12), %p2666_p10, %p2660_p2 }
 0x3e2   : >> { %2150 = vmatmul.mubr.msk.f32.gmra.mrb[2].mxu0 %vm547_vm0, %v3825_v33  ;;  %v3840_v33 = vld [vmem:[#allocation42_spill] sm:$0xff] }
 0x3e3   : >> { %2152 = vmatprep.mubr.msk.f32.mxu0 %vm547_vm0, %v3826_v39  ;;  %v3841_v39 = vld [vmem:[#allocation43_spill] sm:$0xff] }
 0x3e6   : >> { %2153 = vmatmul.mubr.msk.f32.gmra.mrb[4].mxu0 %vm547_vm0, %v3827_v38  ;;  %v3737_v38 = vmov 0.0|0.0  }
 0x3e7   : >> { %2155 = vmatprep.mubr.msk.f32.mxu0 %vm547_vm0, %v3828_v19  ;;  %2243 = vmatprep.subr.bf16.mxu1 %v3737_v38 }
 0x3e8   : >> { %2273 = vmatprep.subr.bf16.mxu0 %v3737_v38 }
 0x3ea   : >> { %2156 = vmatmul.mubr.msk.f32.gmra.mrb[6].mxu0 %vm547_vm0, %v3829_v26 }
 0x3eb   : >> { %2158 = vmatprep.mubr.msk.f32.mxu0 %vm547_vm0, %v3830_v52 }
 0x3ee   : >> { %2159 = vmatmul.mubr.msk.f32.gmra.mrb[8].mxu0 %vm547_vm0, %v3831_v18  ;;  %v3843_v18 = vld [vmem:[#allocation55_spill] sm:$0xff] }
 0x3ef   : >> { %2161 = vmatprep.mubr.msk.f32.mxu0 %vm547_vm0, %v3832_v45 }
 0x3f2   : >> { %2162 = vmatmul.mubr.msk.f32.gmra.mrb[10].mxu0 %vm547_vm0, %v3833_v36 }
 0x3f3   : >> { %2164 = vmatprep.mubr.msk.f32.mxu0 %vm547_vm0, %v3834_v27 }
 0x3f6   : >> { %2165 = vmatmul.mubr.msk.f32.gmra.mrb[12].mxu0 %vm547_vm0, %v3835_v22 }
 0x3f7   : >> { %2167 = vmatprep.mubr.msk.f32.mxu0 %vm547_vm0, %v3836_v55 }
 0x3fa   : >> { %2168 = vmatmul.mubr.msk.f32.gmra.mrb[14].mxu0 %vm547_vm0, %v3837_v51 }
 0x3fb   : >> { %2170 = vmatprep.mubr.msk.f32.mxu0 %vm547_vm0, %v3838_v31 }
 0x3fe   : >> { %2171 = vmatmul.mubr.msk.f32.gmra.mrb[16].mxu0 %vm547_vm0, %v3839_v30 }
 0x3ff   : >> { %2173 = vmatprep.mubr.msk.f32.mxu0 %vm547_vm0, %v3840_v33  ;;  %v3847_v33 = vld [vmem:[#allocation57_spill] sm:$0xff] }
 0x402   : >> { %2174 = vmatmul.mubr.msk.f32.gmra.mrb[18].mxu0 %vm547_vm0, %v3841_v39 }
 0x4b1   : >> { %v2148_v19 = vpop.f32.mrb[0].mxu0 }
 0x4b2   : >> { %v1514_v26 = vmul.f32 %v2148_v19, %v3842_v15  ;;  %v1414_v52 = vpop.f32.mrb[1].mxu0 }
 0x4b3   : >> { %v1513_v45 = vmul.f32 %v1414_v52, %v3843_v18  ;;  %v3850_v52 = vld [vmem:[#allocation47_spill] sm:$0xff] }
 0x4b4   : >> { %v1534_v36 = vadd.f32 %v1514_v26, %v3844_v14 }
 0x4b5   : >> { %v1533_v27 = vadd.f32 %v1513_v45, %v3845_v40  ;;  %v2151_v22 = vpop.f32.mrb[2].mxu0  ;;  %v3851_v45 = vld [vmem:[#allocation45_spill] sm:$0xff] }
 0x4b6   : >> { %v1554_v55 = vmax.f32 %v1534_v36, 0.0  ;;  %v1516_v51 = vmul.f32 %v2151_v22, %v3846_v23  ;;  %v1424_v31 = vpop.f32.mrb[3].mxu0  ;;  %v3852_v36 = vld [vmem:[#allocation46_spill] sm:$0xff]  ;;  %v3853_v23 = vmov 0.0|0.0  }
 0x4b7   : >> { %v1553_v30 = vmax.f32 %v1533_v27, 0.0  ;;  %v1515_v39 = vmul.f32 %v1424_v31, %v3847_v33  ;;  %v3854_v31 = vld [vmem:[#allocation44_spill] sm:$0xff] }
 0x4b8   : >> { %v1536_v38 = vadd.f32 %v1516_v51, %v3848_v50 }
 0x4b9   : >> { %v1535_v7 = vadd.f32 %v1515_v39, %v3849_v10  ;;  %v2154_v19 = vpop.f32.mrb[4].mxu0  ;;  %v2244_v15 = vpack.c.bf16 %v1554_v55, %v1553_v30  ;;  %v3855_v39 = vld [vmem:[#allocation48_spill] sm:$0xff]  ;;  %v3856_v30 = vld [vmem:[#allocation49_spill] sm:$0xff] }
 0x4ba   : >> { %v1556_v37 = vmax.f32 %v1536_v38, 0.0  ;;  %v1518_v18 = vmul.f32 %v2154_v19, %v3850_v52  ;;  %v1434_v26 = vpop.f32.mrb[5].mxu0 }
 0x4bb   : >> { %v1555_v14 = vmax.f32 %v1535_v7, 0.0  ;;  %v1517_v40 = vmul.f32 %v1434_v26, %v3851_v45  ;;  %2245 = vmatpush1.bf16.msra.mxu1 %v2244_v15  ;;  %v3857_v45 = vld [vmem:[#allocation51_spill] sm:$0xff] }
 0x4bc   : >> { %v1538_v22 = vadd.f32 %v1518_v18, %v3852_v36  ;;  %2246 = vmatprep.subr.bf16.mxu1 %v3853_v23 }
 0x4bd   : >> { %v2247_v27 = vpack.c.bf16 %v1556_v37, %v1555_v14  ;;  %v1537_v33 = vadd.f32 %v1517_v40, %v3854_v31  ;;  %v2157_v51 = vpop.f32.mrb[6].mxu0 }
 0x4be   : >> { %v1558_v50 = vmax.f32 %v1538_v22, 0.0  ;;  %v1520_v10 = vmul.f32 %v2157_v51, %v3855_v39  ;;  %v1444_v55 = vpop.f32.mrb[7].mxu0  ;;  %v3858_v22 = vld [vmem:[#allocation52_spill] sm:$0xff] }
 0x4bf   : >> { %v1557_v38 = vmax.f32 %v1537_v33, 0.0  ;;  %v1519_v19 = vmul.f32 %v1444_v55, %v3856_v30  ;;  %2248 = vmatpush1.bf16.msra.mxu1 %v2247_v27 }
 0x4c0   : >> { %v1540_v7 = vadd.f32 %v1520_v10, %v3247_v47  ;;  %2249 = vmatprep.subr.bf16.mxu1 %v3853_v23  ;;  %v3859_v10 = vld [vmem:[#allocation53_spill] sm:$0xff] }
 0x4c1   : >> { %v2250_v15 = vpack.c.bf16 %v1558_v50, %v1557_v38  ;;  %v1539_v52 = vadd.f32 %v1519_v19, %v3249_v48  ;;  %v2160_v18 = vpop.f32.mrb[8].mxu0  ;;  %v3860_v19 = vld [vmem:[#allocation54_spill] sm:$0xff] }
 0x4c2   : >> { %v1560_v14 = vmax.f32 %v1540_v7, 0.0  ;;  %v1522_v40 = vmul.f32 %v2160_v18, %v3251_v49  ;;  %v1454_v37 = vpop.f32.mrb[9].mxu0 }
 0x4c3   : >> { %v1559_v26 = vmax.f32 %v1539_v52, 0.0  ;;  %v1521_v36 = vmul.f32 %v1454_v37, %v3857_v45  ;;  %2251 = vmatpush1.bf16.msra.mxu1 %v2250_v15 }
 0x4c4   : >> { %v1542_v31 = vadd.f32 %v1522_v40, %v3858_v22  ;;  %2252 = vmatprep.subr.bf16.mxu1 %v3853_v23 }
 0x4c5   : >> { %v2253_v27 = vpack.c.bf16 %v1560_v14, %v1559_v26  ;;  %v1541_v33 = vadd.f32 %v1521_v36, %v3859_v10  ;;  %v2163_v51 = vpop.f32.mrb[10].mxu0 }
 0x4c6   : >> { %v1562_v50 = vmax.f32 %v1542_v31, 0.0  ;;  %v1524_v39 = vmul.f32 %v2163_v51, %v3259_v53  ;;  %v1464_v55 = vpop.f32.mrb[11].mxu0 }
 0x4c7   : >> { %v1561_v38 = vmax.f32 %v1541_v33, 0.0  ;;  %v1523_v30 = vmul.f32 %v1464_v55, %v3261_v54  ;;  %2254 = vmatpush1.bf16.msra.mxu1 %v2253_v27 }
 0x4c8   : >> { %v1544_v7 = vadd.f32 %v1524_v39, %v3860_v19  ;;  %2255 = vmatprep.subr.bf16.mxu1 %v3853_v23 }
 0x4c9   : >> { %v2256_v15 = vpack.c.bf16 %v1562_v50, %v1561_v38  ;;  %v1543_v52 = vadd.f32 %v1523_v30, %v3265_v56  ;;  %v2166_v18 = vpop.f32.mrb[12].mxu0 }
 0x4ca   : >> { %v1564_v14 = vmax.f32 %v1544_v7, 0.0  ;;  %v1526_v40 = vmul.f32 %v2166_v18, %v3267_v57  ;;  %v1474_v37 = vpop.f32.mrb[13].mxu0 }
 0x4cb   : >> { %v1563_v26 = vmax.f32 %v1543_v52, 0.0  ;;  %v1525_v45 = vmul.f32 %v1474_v37, %v3269_v58  ;;  %2257 = vmatpush1.bf16.msra.mxu1 %v2256_v15 }
 0x4cc   : >> { %v1546_v36 = vadd.f32 %v1526_v40, %v3271_v59  ;;  %2258 = vmatprep.subr.bf16.mxu1 %v3853_v23 }
 0x4cd   : >> { %v2259_v22 = vpack.c.bf16 %v1564_v14, %v1563_v26  ;;  %v1545_v31 = vadd.f32 %v1525_v45, %v3273_v60  ;;  %v2169_v27 = vpop.f32.mrb[14].mxu0 }
 0x4ce   : >> { %v1566_v10 = vmax.f32 %v1546_v36, 0.0  ;;  %v1528_v33 = vmul.f32 %v2169_v27, %v3275_v61  ;;  %v1484_v51 = vpop.f32.mrb[15].mxu0 }
 0x4cf   : >> { %v1565_v50 = vmax.f32 %v1545_v31, 0.0  ;;  %v1527_v39 = vmul.f32 %v1484_v51, %v3277_v62  ;;  %2260 = vmatpush1.bf16.msra.mxu1 %v2259_v22 }
 0x4d0   : >> { %v1548_v55 = vadd.f32 %v1528_v33, %v3279_v63  ;;  %2261 = vmatprep.subr.bf16.mxu1 %v3853_v23 }
 0x4d1   : >> { %v2262_v38 = vpack.c.bf16 %v1566_v10, %v1565_v50  ;;  %v1547_v30 = vadd.f32 %v1527_v39, %v3281_v0  ;;  %v2172_v19 = vpop.f32.mrb[16].mxu0 }
 0x4d2   : >> { %v1568_v7 = vmax.f32 %v1548_v55, 0.0  ;;  %v1530_v15 = vmul.f32 %v2172_v19, %v3283_v1  ;;  %v1494_v52 = vpop.f32.mrb[17].mxu0  ;;  %v3862_v19 = vld [vmem:[#allocation64_spill] sm:$0xff] }
 0x4d3   : >> { %v1567_v18 = vmax.f32 %v1547_v30, 0.0  ;;  %v1529_v14 = vmul.f32 %v1494_v52, %v3285_v2  ;;  %2263 = vmatpush1.bf16.msra.mxu1 %v2262_v38  ;;  %v3861_v30 = vld [vmem:[#allocation63_spill] sm:$0xff] }
 0x4d4   : >> { %v1550_v40 = vadd.f32 %v1530_v15, %v3287_v3  ;;  %2264 = vmatprep.subr.bf16.mxu1 %v3853_v23  ;;  %v3864_v15 = vld [vmem:[#allocation66_spill] sm:$0xff]  ;;  %v3865_v52 = vld [vmem:[#allocation67_spill] sm:$0xff] }
 0x4d5   : >> { %v2265_v37 = vpack.c.bf16 %v1568_v7, %v1567_v18  ;;  %v1549_v26 = vadd.f32 %v1529_v14, %v3289_v4  ;;  %v2175_v45 = vpop.f32.mrb[18].mxu0  ;;  %v3863_v7 = vld [vmem:[#allocation65_spill] sm:$0xff]  ;;  %v3866_v18 = vld [vmem:[#allocation68_spill] sm:$0xff] }
 0x4d6   : >> { %v1570_v36 = vmax.f32 %v1550_v40, 0.0  ;;  %v1532_v22 = vmul.f32 %v2175_v45, %v3291_v6  ;;  %v1504_v31 = vpop.f32.mrb[19].mxu0  ;;  %v3867_v14 = vld [vmem:[#allocation69_spill] sm:$0xff]  ;;  %v3868_v40 = vld [vmem:[#allocation70_spill] sm:$0xff] }
 0x4d7   : >> { %v1569_v27 = vmax.f32 %v1549_v26, 0.0  ;;  %v1531_v10 = vmul.f32 %v1504_v31, %v3293_v8  ;;  %2266 = vmatpush1.bf16.msra.mxu1 %v2265_v37  ;;  %v3869_v37 = vld [vmem:[#allocation71_spill] sm:$0xff]  ;;  %v3870_v26 = vld [vmem:[#allocation72_spill] sm:$0xff]  ;;  %v3871_v45 = vld [vmem:[#allocation73_spill] sm:$0xff] }
 0x4d8   : >> { %v1552_v33 = vadd.f32 %v1532_v22, %v3295_v9  ;;  %2267 = vmatprep.subr.bf16.mxu1 %v3853_v23  ;;  %v3873_v22 = vld [vmem:[#allocation75_spill] sm:$0xff]  ;;  %v3874_v31 = vld [vmem:[#allocation76_spill] sm:$0xff] }
 0x4d9   : >> { %v2268_v51 = vpack.c.bf16 %v1570_v36, %v1569_v27  ;;  %v1551_v50 = vadd.f32 %v1531_v10, %v3297_v12  ;;  %v3872_v36 = vld [vmem:[#allocation74_spill] sm:$0xff]  ;;  %v2775_v27 = vmov 0.0  }
 0x4da   : >> { %v1572_v39 = vmax.f32 %v1552_v33, 0.0  ;;  %2192 = vmatprep.mubr.msk.f32.mxu0 %vm2774_vm4, %v2775_v27 }
 0x4db   : >> { %v1571_v55 = vmax.f32 %v1551_v50, 0.0  ;;  %2269 = vmatpush1.bf16.msra.mxu1 %v2268_v51 }
 0x4dc   : >> { %2270 = vmatprep.subr.bf16.mxu1 %v3853_v23 }
 0x4dd   : >> { %v2271_v38 = vpack.c.bf16 %v1572_v39, %v1571_v55 }
 0x4df   : >> { %2272 = vmatpush1.bf16.msra.mxu1 %v2271_v38 }
 0x4e2   : >> { %1638 = vmatmul.mubr.f32.vlgmr.msra.gmra.mrb[0].mxu1 %v3388_v44 }
 0x4e3   : >> { %2015 = vmatprep.mubr.msk.f32.mxu1 %vm1017_vm1, %v3861_v30 }
 0x4e6   : >> { %1643 = vmatmul.mubr.f32.gmra.mrb[2].mxu1 %v3862_v19 }
 0x4e7   : >> { %2016 = vmatprep.mubr.msk.f32.mxu1 %vm1017_vm1, %v3863_v7 }
 0x4ea   : >> { %1648 = vmatmul.mubr.f32.gmra.mrb[4].mxu1 %v3864_v15 }
 0x4eb   : >> { %2017 = vmatprep.mubr.msk.f32.mxu1 %vm1017_vm1, %v3865_v52 }
 0x4ee   : >> { %1653 = vmatmul.mubr.f32.gmra.mrb[6].mxu1 %v3866_v18 }
 0x4ef   : >> { %2018 = vmatprep.mubr.msk.f32.mxu1 %vm1017_vm1, %v3867_v14 }
 0x4f2   : >> { %1658 = vmatmul.mubr.f32.gmra.mrb[8].mxu1 %v3868_v40 }
 0x4f3   : >> { %2019 = vmatprep.mubr.msk.f32.mxu1 %vm1017_vm1, %v3869_v37 }
 0x4f6   : >> { %1663 = vmatmul.mubr.f32.gmra.mrb[10].mxu1 %v3870_v26 }
 0x4f7   : >> { %2020 = vmatprep.mubr.msk.f32.mxu1 %vm1017_vm1, %v3871_v45 }
 0x4fa   : >> { %1668 = vmatmul.mubr.f32.gmra.mrb[12].mxu1 %v3872_v36 }
 0x4fb   : >> { %2021 = vmatprep.mubr.msk.f32.mxu1 %vm1017_vm1, %v3873_v22 }
 0x4fe   : >> { %1673 = vmatmul.mubr.f32.gmra.mrb[14].mxu1 %v3874_v31 }
 0x5b5   : >> { %v1639_v10 = vpop.f32.mrb[0].mxu1 }
 0x5b6   : >> { %v1678_v33 = vmul.f32 %v1639_v10, %v3301_v16  ;;  %v1641_v51 = vpop.f32.mrb[1].mxu1 }
 0x5b8   : >> { %v1686_v39 = vadd.f32 %v1678_v33, %v3305_v20 }
 0x5b9   : >> { %v1644_v50 = vpop.f32.mrb[2].mxu1 }
 0x5ba   : >> { %v1679_v55 = vmul.f32 %v1644_v50, %v3299_v13  ;;  %v1646_v38 = vpop.f32.mrb[3].mxu1  ;;  %v1694_v7 = vmax.f32 %v1686_v39, 0.0 }
 0x5bc   : >> { %v1687_v30 = vadd.f32 %v1679_v55, %v3303_v17 }
 0x5bd   : >> { %v1649_v19 = vpop.f32.mrb[4].mxu1 }
 0x5be   : >> { %v1695_v15 = vmax.f32 %v1687_v30, 0.0  ;;  %v1680_v52 = vmul.f32 %v1649_v19, %v3309_v25  ;;  %v1651_v18 = vpop.f32.mrb[5].mxu1 }
 0x5c0   : >> { %v2274_v14 = vpack.c.bf16 %v1695_v15, %v1694_v7  ;;  %v1688_v37 = vadd.f32 %v1680_v52, %v3313_v29 }
 0x5c1   : >> { %v1654_v40 = vpop.f32.mrb[6].mxu1 }
 0x5c2   : >> { %v1681_v26 = vmul.f32 %v1654_v40, %v3307_v24  ;;  %2275 = vmatpush3.bf16.msra.mxu0 %v2274_v14  ;;  %v1656_v45 = vpop.f32.mrb[7].mxu1  ;;  %v1696_v31 = vmax.f32 %v1688_v37, 0.0 }
 0x5c3   : >> { %2276 = vmatprep.subr.bf16.mxu0 %v3853_v23 }
 0x5c4   : >> { %v1689_v36 = vadd.f32 %v1681_v26, %v3311_v28 }
 0x5c5   : >> { %v1659_v22 = vpop.f32.mrb[8].mxu1 }
 0x5c6   : >> { %v1697_v27 = vmax.f32 %v1689_v36, 0.0  ;;  %v1682_v10 = vmul.f32 %v1659_v22, %v3317_v5  ;;  %v1661_v33 = vpop.f32.mrb[9].mxu1 }
 0x5c8   : >> { %v2277_v51 = vpack.c.bf16 %v1697_v27, %v1696_v31  ;;  %v1690_v39 = vadd.f32 %v1682_v10, %v3321_v46  ;;  %v1773_v10 = vrot.slane %v2751_v41, 1 }
 0x5c9   : >> { %v1664_v50 = vpop.f32.mrb[10].mxu1 }
 0x5ca   : >> { %v1683_v55 = vmul.f32 %v1664_v50, %v3315_v32  ;;  %2278 = vmatpush3.bf16.msra.mxu0 %v2277_v51  ;;  %v1666_v38 = vpop.f32.mrb[11].mxu1  ;;  %v1698_v7 = vmax.f32 %v1690_v39, 0.0  ;;  %v3875_v50 = vld [vmem:[#allocation77_spill] sm:$0xff] }
 0x5cb   : >> { %2279 = vmatprep.subr.bf16.mxu0 %v3853_v23 }
 0x5cc   : >> { %v1691_v30 = vadd.f32 %v1683_v55, %v3319_v21 }
 0x5cd   : >> { %v1669_v19 = vpop.f32.mrb[12].mxu1 }
 0x5ce   : >> { %v1699_v15 = vmax.f32 %v1691_v30, 0.0  ;;  %v1684_v52 = vmul.f32 %v1669_v19, %v3325_v42  ;;  %v1671_v18 = vpop.f32.mrb[13].mxu1 }
 0x5d0   : >> { %v2280_v14 = vpack.c.bf16 %v1699_v15, %v1698_v7  ;;  %v1692_v37 = vadd.f32 %v1684_v52, %v3329_v34 }
 0x5d1   : >> { %v1674_v40 = vpop.f32.mrb[14].mxu1 }
 0x5d2   : >> { %2281 = vmatpush3.bf16.msra.mxu0 %v2280_v14  ;;  %v1685_v26 = vmul.f32 %v1674_v40, %v3323_v43  ;;  %v1676_v45 = vpop.f32.mrb[15].mxu1  ;;  %v1700_v22 = vmax.f32 %v1692_v37, 0.0 }
 0x5d3   : >> { %2282 = vmatprep.subr.bf16.mxu0 %v3853_v23 }
 0x5d4   : >> { %v1693_v36 = vadd.f32 %v1685_v26, %v3327_v35 }
 0x5d6   : >> { %v1701_v31 = vmax.f32 %v1693_v36, 0.0 }
 0x5d8   : >> { %v2283_v27 = vpack.c.bf16 %v1701_v31, %v1700_v22 }
 0x5da   : >> { %2284 = vmatpush3.bf16.msra.mxu0 %v2283_v27 }
 0x5dd   : >> { %2193 = vmatmul.mubr.msk.f32.vlgmr.msra.gmra.mrb[20].mxu0 %vm1251_vm3, %v3460_v11 }
 0x6af   : > { %1340 = sbr.rel (!%p1338_p12) target bundleno = 980 (0x3d4), region = 138 }
 0x6b0   : >> { %v1768_v41 = vpop.f32.mrb[20].mxu0  }
 0x6b1   : >> { %v1775_v33 = vadd.f32 %v1773_v10, %v1768_v41  ;;  %v2194_v51 = vpop.f32.mrb[21].mxu0 }
 0x6b3   : >> { %v1776_v39 = vadd.f32 %v1775_v33, %v3875_v50 }
 0x6b5   : >> { %1778 = vst [vmem:[%s1777_s28] sm:$0x1] %v1776_v39 }
 0x6b6   : > { %2670 = shalt.err (!%p2667_p11)
}
 0x6b7   : > { %s2671_s16 = scalar_lea.hbm %s3633_s24, 128  ;;  %s2675_s25 = scalar_lea.hbm %s3681_s9, 256 }
 0x6b8   : > { %p2672_p3 = scmp.ne.s32.totalorder %s3633_s24, %s2671_s16  ;;  %p2676_p7 = scmp.lt.u32.totalorder %s3633_s24, %s3681_s9 }
 0x6b9   : > { %p2677_p4 = scmp.lt.u32.totalorder %s2675_s25, %s2671_s16  ;;  %p2679_p1 = scmp.lt.u32.totalorder %s2671_s16, %s3633_s24 }
 0x6ba   : > { %p2673_p5 = pnand %p2672_p3, %p3876_p13 }
 0x6bb   : > { %p2678_p12 = por %p2677_p4, %p2676_p7 }
 0x6bc   : > { %p2674_p9 = pneg %p2673_p5 }
 0x6bd   : > { %p2680_p0 = por %p2679_p1, %p2678_p12 }
 0x6bf   : > { %p2681_p2 = pnand %p2680_p0, %p2674_p9 }
 0x6c1   : > { %2684 = shalt.err (!%p2681_p2)
}
 0x6c2   : > { %2315 = dma.vmem_to_hbm [thread:$0]  (%p3876_p13), %s1794_s26, 128, %s3633_s24, %s1780_s23  }
 0x6c3 PF: > { %s1805_s18 = sand.u32 1, %s2735_s11   ;;  %p3877_p8 = scmp.ne.s32.totalorder %s3753_s27, 0 }
 0x6c4   : > { %p3878_p6 = scmp.ge.s32.totalorder %s2747_s14, 2  ;;  %s1806_s10 = scalar_lea.sflag [#allocation5], %s1805_s18 }
 0x6c6   : > { %p2344_p10 = pnand %p3878_p6, %p3877_p8 }
 0x6c8   : > { %2730 = dma.done.wait (!%p2344_p10), %s1806_s10, 128  }
 0x6c9   : > { %2732 = vsyncadd (!%p2344_p10), %s1806_s10, 4294967168  ;;  %p28_p11 = scmp.ge.s32.totalorder %s3041_s20, 4   ;;  %s3879_s11 = smov %s2739_s12 }
 0x6ca   : > { %s3880_s12 = smov %s2743_s13  ;;  %s3881_s13 = smov %s3053_s1 }
 0x6cb   : > { %s3882_s14 = smov %s3041_s20  ;;  %30 = sbr.rel (!%p28_p11) target bundleno = 12 (0xc), region = 149 }
 0x6d2   :  { %1811 = vsyncpa [#allocation4], 1 }
 0x6d3   :  { %1813 = vsyncpa [#allocation4 + $0x1], 1 }
 0x6d4   :  { %1814 = vsyncpa [#allocation7], 1 }
 0x6d5   :  { %1815 = vsyncpa [#allocation10], 1 }
 0x6d6   :  { %1816 = vsyncpa [#allocation13], 1 }
 0x6d7   :  { %1817 = vsyncpa [#allocation16], 1 }
 0x6d8   :  { %1818 = vsyncpa [#allocation5], 1 }
 0x6d9   :  { %1820 = vsyncpa [#allocation5 + $0x1], 1 }

</bundles_post_ra>
